<compile_context>
chip_gen: v6e
topology: v6e:2x2x1
jax: 0.10.0
libtpu: 0.0.40
codegen_flags: <defaults>
</compile_context>

<pallas_src>
import numpy as np
import jax
import jax.numpy as jnp
from jax.experimental import pallas as pl
from jax.experimental.pallas import tpu as pltpu


# ----------------------------------------------------------------------------- kernel
def idetect_kernel(lvl_ref, base_ref, nx_ref, ny_ref,      # scalar-prefetch (SMEM)
                   x_ref, w_ref, c_ref,                    # inputs
                   raw_ref, dec_ref):                      # outputs
    # x_ref : (tm, Cmax)       bf16  input feature rows (channels zero-padded)
    # w_ref : (1, Cmax, Kpad)  bf16  folded 1x1 conv weight for this tile's level
    # c_ref : (1, 8, Kpad)     f32   packed per-channel constants:
    #         row 0: b' (fused bias)  1: mul  2: addx  3: addy  4: addc
    #         row 5: iswh             6: 1-iswh            7: zeros
    i = pl.program_id(0)
    tm = x_ref.shape[0]

    c = c_ref[0]                                                  # (8, Kpad) f32
    # fused 1x1 conv (ImplicitA / ImplicitM already folded into W'/b' on the host);
    # bf16 MXU inputs, f32 accumulation.
    t = jnp.dot(x_ref[...], w_ref[0], preferred_element_type=jnp.float32)
    t = t + c[0:1, :]
    raw_ref[...] = t.astype(raw_ref.dtype)

    # sigmoid with a single EUP transcendental: sigmoid(t) = 0.5*tanh(t/2) + 0.5
    sig = 0.5 * jnp.tanh(0.5 * t) + 0.5

    # per-row grid coordinates generated in-kernel (rows are ordered (b, y, x))
    base = base_ref[i]
    nxf = nx_ref[i].astype(jnp.float32)
    nyf = ny_ref[i].astype(jnp.float32)
    inv_nx = 1.0 / nxf                     # once per tile; per-row ops are multiplies
    inv_ny = 1.0 / nyf
    r = (jax.lax.broadcasted_iota(jnp.int32, (tm, 1), 0) + base).astype(jnp.float32)
    # +0.5 keeps floor() exact at r == k*nx even through the reciprocal multiply
    q = jnp.floor((r + 0.5) * inv_nx)               # b*ny + y
    gx = r - nxf * q                                # x = r mod nx   (exact: ints < 2^23)
    gy = q - nyf * jnp.floor((q + 0.5) * inv_ny)    # y = (r // nx) mod ny

    mul, addx, addy = c[1:2, :], c[2:3, :], c[3:4, :]
    addc, iswh, notwh = c[4:5, :], c[5:6, :], c[6:7, :]
    # xy:   mul*sig + addx*gx + addy*gy + addc   (mul=2s, addx/addy=s, addc=-s/2)
    # wh:   mul*sig^2                            (mul=4*anchor)
    # conf: sig                                  (mul=1, adds=0)
    dec = mul * sig * (iswh * sig + notwh) + (addx * gx + addy * gy + addc)
    dec_ref[...] = dec.astype(dec_ref.dtype)


def idetect_fused(lvl_t, base_t, nx_t, ny_t, x_stk, w_stk, c_stk, *, tm, vmem_limit):
    Mtot, Cmax = x_stk.shape
    _, _, Kpad = w_stk.shape
    ntiles = Mtot // tm

    row_spec = lambda shape: pl.BlockSpec(shape, lambda i, lvl, base, nx, ny: (i, 0))
    lvl_spec = lambda shape: pl.BlockSpec(
        shape, lambda i, lvl, base, nx, ny: (lvl[i], 0, 0))

    raw, dec = pl.pallas_call(
        idetect_kernel,
        out_shape=(jax.ShapeDtypeStruct((Mtot, Kpad), jnp.float32),    # raw logits
                   jax.ShapeDtypeStruct((Mtot, Kpad), jnp.bfloat16)),  # decoded boxes
        grid_spec=pltpu.PrefetchScalarGridSpec(
            num_scalar_prefetch=4,
            grid=(ntiles,),
            in_specs=[row_spec((tm, Cmax)),
                      lvl_spec((1, Cmax, Kpad)),
                      lvl_spec((1, 8, Kpad))],
            out_specs=[row_spec((tm, Kpad)), row_spec((tm, Kpad))],
        ),
        compiler_params=pltpu.CompilerParams(
            dimension_semantics=("parallel",),
            vmem_limit_bytes=vmem_limit),
    )(lvl_t, base_t, nx_t, ny_t, x_stk, w_stk, c_stk)
    return raw, dec


# ----------------------------------------------------------------------------- helpers
def _round_up(v, m):
    return (v + m - 1) // m * m


def _tpu_vmem_bytes():
    # Generation-aware VMEM capacity; conservative (v7x per-TC) fallback.
    try:
        info = pltpu.get_tpu_info()
        return int(getattr(info, "vmem_capacity_bytes", 64 * 1024 * 1024))
    except Exception:
        return 64 * 1024 * 1024


def _step_bytes(tm, cmax, kpad):
    # double-buffered x tile (bf16) + raw tile (f32) + dec tile (bf16)
    return 2 * tm * (2 * cmax) + 2 * tm * (4 * kpad) + 2 * tm * (2 * kpad)


def _pick_tm(ms_list, cmax, kpad, budget_bytes):
    # Cap tm by the smallest level's row count (rounded to 128) so per-level
    # padding waste stays bounded; otherwise grow to the VMEM budget.
    cap = max(128, _round_up(min(ms_list), 128))
    tm = 2048
    while tm > 128:
        if tm <= cap and _step_bytes(tm, cmax, kpad) <= budget_bytes:
            return tm
        tm //= 2
    return 128


# ----------------------------------------------------------------------------- module
class IDetectPallas:
    def __init__(self, nc, anchors, ch, stride, key):
        self.nc = nc
        self.no = nc + 5
        self.nl = len(anchors)
        self.na = len(anchors[0]) // 2
        self.ch = tuple(ch)
        self.K = self.no * self.na
        self.Kpad = _round_up(self.K, 128)
        self.Cmax = _round_up(max(ch), 128)   # lane-dense x loads / packed MXU LHS
        self.anchors = jnp.asarray(anchors, jnp.float32).reshape(self.nl, self.na, 2)
        self.stride = jnp.asarray(stride, jnp.float32)
        self.stride_np = [float(s) for s in stride]

        K = self.K
        self.W, self.b, self.ia, self.im = [], [], [], []
        for i, c in enumerate(ch):
            k1, k2, k3, k4, key = jax.random.split(key, 5)
            # conv weight stored as (C, K) for matmul (PyTorch weight is (K, C, 1, 1))
            self.W.append(jax.random.normal(k1, (c, K), jnp.float32) * 0.1)
            self.b.append(jax.random.normal(k2, (K,), jnp.float32) * 0.1)
            self.ia.append(jax.random.normal(k3, (c,), jnp.float32) * 0.02)        # ImplicitA ~ N(0,.02)
            self.im.append(1.0 + jax.random.normal(k4, (K,), jnp.float32) * 0.02)  # ImplicitM ~ N(1,.02)

        self._build_packed()

    def _build_packed(self):
        """Fold ImplicitA/ImplicitM into W/b and pack decode constants per level."""
        nl, no, K, Kp, Cmax = self.nl, self.no, self.K, self.Kpad, self.Cmax
        W_stk = np.zeros((nl, Cmax, Kp), np.float32)
        C_stk = np.zeros((nl, 8, Kp), np.float32)
        o = np.arange(K) % no
        a = np.arange(K) // no
        for i in range(nl):
            C = self.ch[i]
            W = np.asarray(self.W[i])
            b = np.asarray(self.b[i])
            ia = np.asarray(self.ia[i])
            im = np.asarray(self.im[i])
            s = self.stride_np[i]
            anc = np.asarray(self.anchors[i])

            W_stk[i, :C, :K] = W * im[None, :]            # W' = W * im
            bf = (b + ia @ W) * im                        # b' = (b + ia @ W) * im

            mul = np.ones(K, np.float32)
            mul[(o == 0) | (o == 1)] = 2.0 * s
            mul[o == 2] = 4.0 * anc[a[o == 2], 0]
            mul[o == 3] = 4.0 * anc[a[o == 3], 1]
            addx = np.where(o == 0, s, 0.0).astype(np.float32)
            addy = np.where(o == 1, s, 0.0).astype(np.float32)
            addc = (-0.5 * (addx + addy)).astype(np.float32)
            iswh = ((o == 2) | (o == 3)).astype(np.float32)

            C_stk[i, 0, :K] = bf
            C_stk[i, 1, :K] = mul
            C_stk[i, 2, :K] = addx
            C_stk[i, 3, :K] = addy
            C_stk[i, 4, :K] = addc
            C_stk[i, 5, :K] = iswh
            C_stk[i, 6, :K] = 1.0 - iswh
            # row 7 and padded K columns stay 0 -> padded outputs are exactly 0
        self.W_stk = jnp.asarray(W_stk, jnp.bfloat16)     # bf16 MXU weights
        self.C_stk = jnp.asarray(C_stk, jnp.float32)

    def __call__(self, xs):
        # xs: list of NCHW feature maps. Returns (z_cat, x_list) like PyTorch inference.
        Cmax, Kp, K = self.Cmax, self.Kpad, self.K
        shapes = [x.shape for x in xs]
        Ms = [b * ny * nx for (b, c, ny, nx) in shapes]

        vmem_cap = _tpu_vmem_bytes()
        big_vmem = vmem_cap >= 100 * 1024 * 1024                    # v5e / v6e (128 MiB)
        budget = (80 if big_vmem else 40) * 1024 * 1024
        limit_cap = (96 if big_vmem else 48) * 1024 * 1024
        tm = _pick_tm(Ms, Cmax, Kp, budget)
        Mp = [_round_up(M, tm) for M in Ms]

        resident = 2 * (Cmax * Kp * 2 + 8 * Kp * 4)                 # W (bf16) + consts (f32)
        vmem_limit = int(min(limit_cap,
                             max(32 * 1024 * 1024,
                                 2 * (_step_bytes(tm, Cmax, Kp) + resident))))

        x_rows, metas = [], []
        for i, x in enumerate(xs):
            bs, C, ny, nx = x.shape
            M = Ms[i]
            assert Mp[i] < (1 << 23), "row indices must stay exact in f32"
            # TODO(synk): transpose disappears with channels-last activations upstream
            xf = jnp.transpose(x.astype(jnp.bfloat16), (0, 2, 3, 1)).reshape(M, C)
            xf = jnp.pad(xf, ((0, Mp[i] - M), (0, Cmax - C)))
            x_rows.append(xf)
            for t in range(Mp[i] // tm):
                metas.append((i, t * tm, nx, ny))   # (level, row base in level, nx, ny)
        x_stk = jnp.concatenate(x_rows, axis=0)
        meta = np.asarray(metas, np.int32)
        lvl_t, base_t, nx_t, ny_t = (jnp.asarray(meta[:, j]) for j in range(4))

        raw_all, dec_all = idetect_fused(lvl_t, base_t, nx_t, ny_t,
                                         x_stk, self.W_stk, self.C_stk,
                                         tm=tm, vmem_limit=vmem_limit)

        x_out, zs = [], []
        off = 0
        for i, x in enumerate(xs):
            bs, C, ny, nx = x.shape
            M = Ms[i]
            r = raw_all[off:off + M, :K].reshape(bs, ny, nx, self.na, self.no)
            d = dec_all[off:off + M, :K].astype(jnp.float32)   # module contract: f32 boxes
            d = d.reshape(bs, ny, nx, self.na, self.no)
            x_out.append(jnp.transpose(r, (0, 3, 1, 2, 4)))    # (bs, na, ny, nx, no)
            zs.append(jnp.transpose(d, (0, 3, 1, 2, 4)).reshape(bs, -1, self.no))
            off += Mp[i]
        return jnp.concatenate(zs, axis=1), x_out


# ----------------------------------------------------------------------------- reference (pure JAX, f32)
def reference(model, xs):
    zs, x_out = [], []
    for i, x in enumerate(xs):
        bs, C, ny, nx = x.shape
        xin = x + model.ia[i].reshape(1, C, 1, 1)
        t = jnp.einsum('bchw,ck->bkhw', xin, model.W[i]) + model.b[i].reshape(1, -1, 1, 1)
        t = t * model.im[i].reshape(1, -1, 1, 1)
        t = jnp.transpose(t.reshape(bs, model.na, model.no, ny, nx), (0, 1, 3, 4, 2))
        x_out.append(t)
        y = jax.nn.sigmoid(t)
        yv, xv = jnp.meshgrid(jnp.arange(ny), jnp.arange(nx), indexing='ij')
        g = jnp.stack((xv, yv), 2).reshape(1, 1, ny, nx, 2).astype(jnp.float32)
        xy = (y[..., 0:2] * 2.0 - 0.5 + g) * model.stride[i]
        wh = (y[..., 2:4] * 2.0) ** 2 * model.anchors[i].reshape(1, model.na, 1, 1, 2)
        yd = jnp.concatenate([xy, wh, y[..., 4:]], axis=-1)
        zs.append(yd.reshape(bs, -1, model.no))
    return jnp.concatenate(zs, axis=1), x_out


# ----------------------------------------------------------------------------- main
if __name__ == "__main__":
    key = jax.random.PRNGKey(0)
    nc = 3                                   # small class count -> no = 8, K = 24
    anchors = [[10, 13, 16, 30, 33, 23],
               [30, 61, 62, 45, 59, 119],
               [116, 90, 156, 198, 373, 326]]
    ch = (4, 8, 16)
    stride = [8.0, 16.0, 32.0]
    bs = 2
    spatial = [(8, 8), (4, 4), (2, 2)]       # consistent with strides on a 64x64 image

    kmodel, kx = jax.random.split(key)
    model = IDetectPallas(nc, anchors, ch, stride, kmodel)

    xs = []
    for i, (ny, nx) in enumerate(spatial):
        kx, sub = jax.random.split(kx)
        xs.append(jax.random.normal(sub, (bs, ch[i], ny, nx), jnp.float32))

    z, x_list = model(xs)
    jax.block_until_ready(z)
    for t in x_list:
        jax.block_until_ready(t)

    z_ref, x_refs = reference(model, xs)
    # raw logits: kernel matmul uses bf16 MXU inputs (f32 accumulation) -> ~1e-2 tol
    for a_, b_ in zip(x_list, x_refs):
        assert jnp.allclose(a_, b_, atol=3e-2, rtol=3e-2), "raw logits mismatch"
    # decoded boxes: bf16 matmul inputs + bf16 decode writeback -> looser tolerance
    assert jnp.allclose(z, z_ref, atol=3e-1, rtol=3e-2), "decoded outputs mismatch"

    print("KERNEL_OK")
</pallas_src>

<mosaic_0001>
module attributes {stable_mosaic.version = 11 : i64} {
  func.func @idetect_kernel(%arg0: i32, %arg1: memref<3xi32, #tpu.memory_space<smem>>, %arg2: memref<3xi32, #tpu.memory_space<smem>>, %arg3: memref<3xi32, #tpu.memory_space<smem>>, %arg4: memref<3xi32, #tpu.memory_space<smem>>, %arg5: memref<128x128xbf16, #tpu.memory_space<vmem>>, %arg6: memref<1x128x128xbf16, #tpu.memory_space<vmem>>, %arg7: memref<1x8x128xf32, #tpu.memory_space<vmem>>, %arg8: memref<128x128xf32, #tpu.memory_space<vmem>>, %arg9: memref<128x128xbf16, #tpu.memory_space<vmem>>) attributes {dimension_semantics = [#tpu.dimension_semantics<parallel>], iteration_bounds = array<i64: 3>, scalar_prefetch = 4 : i64, scratch_operands = 0 : i64, tpu.core_type = #tpu.core_type<tc>, window_params = [{transform_indices = @transform_0, window_bounds = array<i64: 128, 128>}, {transform_indices = @transform_1, window_bounds = array<i64: 1, 128, 128>}, {transform_indices = @transform_2, window_bounds = array<i64: 1, 8, 128>}, {transform_indices = @transform_3, window_bounds = array<i64: 128, 128>}, {transform_indices = @transform_4, window_bounds = array<i64: 128, 128>}]} {
    %c0 = arith.constant 0 : index
    %c0_0 = arith.constant 0 : index
    %c0_1 = arith.constant 0 : index
    %0 = vector.load %arg7[%c0, %c0_0, %c0_1] : memref<1x8x128xf32, #tpu.memory_space<vmem>>, vector<1x8x128xf32>
    %1 = vector.shape_cast %0 : vector<1x8x128xf32> to vector<8x128xf32>
    %c0_2 = arith.constant 0 : index
    %c0_3 = arith.constant 0 : index
    %2 = vector.load %arg5[%c0_2, %c0_3] : memref<128x128xbf16, #tpu.memory_space<vmem>>, vector<128x128xbf16>
    %c0_4 = arith.constant 0 : index
    %c0_5 = arith.constant 0 : index
    %c0_6 = arith.constant 0 : index
    %3 = vector.load %arg6[%c0_4, %c0_5, %c0_6] : memref<1x128x128xbf16, #tpu.memory_space<vmem>>, vector<1x128x128xbf16>
    %4 = vector.shape_cast %3 : vector<1x128x128xbf16> to vector<128x128xbf16>
    %cst = arith.constant dense<0.000000e+00> : vector<128x128xf32>
    %5 = tpu.matmul %2, %4, %cst {dimension_numbers = #tpu.dot_dimension_numbers<[1], [0], [0], [1], [0, 0, 1, 1], [], []>} : vector<128x128xbf16>, vector<128x128xbf16>, vector<128x128xf32> -> vector<128x128xf32>
    %6 = vector.extract_strided_slice %1 {offsets = [0, 0], sizes = [1, 128], strides = [1, 1]} : vector<8x128xf32> to vector<1x128xf32>
    %7 = vector.broadcast %6 : vector<1x128xf32> to vector<128x128xf32>
    %8 = arith.addf %5, %7 : vector<128x128xf32>
    %c0_7 = arith.constant 0 : index
    %c0_8 = arith.constant 0 : index
    %9 = vector.load %arg8[%c0_7, %c0_8] : memref<128x128xf32, #tpu.memory_space<vmem>>, vector<128x128xf32>
    tpu.vector_store %arg8[%c0_7, %c0_8], %8 {strides = array<i32>} : memref<128x128xf32, #tpu.memory_space<vmem>>, vector<128x128xf32>,
    %cst_9 = arith.constant 5.000000e-01 : f32
    %10 = vector.broadcast %cst_9 : f32 to vector<128x128xf32>
    %11 = arith.mulf %10, %8 : vector<128x128xf32>
    %12 = math.tanh %11 : vector<128x128xf32>
    %cst_10 = arith.constant 5.000000e-01 : f32
    %13 = vector.broadcast %cst_10 : f32 to vector<128x128xf32>
    %14 = arith.mulf %13, %12 : vector<128x128xf32>
    %cst_11 = arith.constant 5.000000e-01 : f32
    %15 = vector.broadcast %cst_11 : f32 to vector<128x128xf32>
    %16 = arith.addf %14, %15 : vector<128x128xf32>
    %17 = arith.index_cast %arg0 : i32 to index
    %18 = memref.load %arg2[%17] : memref<3xi32, #tpu.memory_space<smem>>
    %19 = arith.index_cast %arg0 : i32 to index
    %20 = memref.load %arg3[%19] : memref<3xi32, #tpu.memory_space<smem>>
    %21 = arith.sitofp %20 : i32 to f32
    %22 = arith.index_cast %arg0 : i32 to index
    %23 = memref.load %arg4[%22] : memref<3xi32, #tpu.memory_space<smem>>
    %24 = arith.sitofp %23 : i32 to f32
    %cst_12 = arith.constant 1.000000e+00 : f32
    %25 = arith.divf %cst_12, %21 : f32
    %cst_13 = arith.constant 1.000000e+00 : f32
    %26 = arith.divf %cst_13, %24 : f32
    %27 = tpu.iota {dimensions = array<i32: 0>} : vector<128x1xi32>
    %28 = vector.broadcast %18 : i32 to vector<128x1xi32>
    %29 = arith.addi %27, %28 : vector<128x1xi32>
    %30 = arith.sitofp %29 : vector<128x1xi32> to vector<128x1xf32>
    %cst_14 = arith.constant 5.000000e-01 : f32
    %31 = vector.broadcast %cst_14 : f32 to vector<128x1xf32>
    %32 = arith.addf %30, %31 : vector<128x1xf32>
    %33 = vector.broadcast %25 : f32 to vector<128x1xf32>
    %34 = arith.mulf %32, %33 : vector<128x1xf32>
    %35 = math.floor %34 : vector<128x1xf32>
    %36 = vector.broadcast %21 : f32 to vector<128x1xf32>
    %37 = arith.mulf %36, %35 : vector<128x1xf32>
    %38 = arith.subf %30, %37 : vector<128x1xf32>
    %cst_15 = arith.constant 5.000000e-01 : f32
    %39 = vector.broadcast %cst_15 : f32 to vector<128x1xf32>
    %40 = arith.addf %35, %39 : vector<128x1xf32>
    %41 = vector.broadcast %26 : f32 to vector<128x1xf32>
    %42 = arith.mulf %40, %41 : vector<128x1xf32>
    %43 = math.floor %42 : vector<128x1xf32>
    %44 = vector.broadcast %24 : f32 to vector<128x1xf32>
    %45 = arith.mulf %44, %43 : vector<128x1xf32>
    %46 = arith.subf %35, %45 : vector<128x1xf32>
    %47 = vector.extract_strided_slice %1 {offsets = [1, 0], sizes = [1, 128], strides = [1, 1]} : vector<8x128xf32> to vector<1x128xf32>
    %48 = vector.extract_strided_slice %1 {offsets = [2, 0], sizes = [1, 128], strides = [1, 1]} : vector<8x128xf32> to vector<1x128xf32>
    %49 = vector.extract_strided_slice %1 {offsets = [3, 0], sizes = [1, 128], strides = [1, 1]} : vector<8x128xf32> to vector<1x128xf32>
    %50 = vector.extract_strided_slice %1 {offsets = [4, 0], sizes = [1, 128], strides = [1, 1]} : vector<8x128xf32> to vector<1x128xf32>
    %51 = vector.extract_strided_slice %1 {offsets = [5, 0], sizes = [1, 128], strides = [1, 1]} : vector<8x128xf32> to vector<1x128xf32>
    %52 = vector.extract_strided_slice %1 {offsets = [6, 0], sizes = [1, 128], strides = [1, 1]} : vector<8x128xf32> to vector<1x128xf32>
    %53 = vector.broadcast %47 : vector<1x128xf32> to vector<128x128xf32>
    %54 = arith.mulf %53, %16 : vector<128x128xf32>
    %55 = vector.broadcast %51 : vector<1x128xf32> to vector<128x128xf32>
    %56 = arith.mulf %55, %16 : vector<128x128xf32>
    %57 = vector.broadcast %52 : vector<1x128xf32> to vector<128x128xf32>
    %58 = arith.addf %56, %57 : vector<128x128xf32>
    %59 = arith.mulf %54, %58 : vector<128x128xf32>
    %60 = vector.broadcast %48 : vector<1x128xf32> to vector<128x128xf32>
    %61 = vector.broadcast %38 : vector<128x1xf32> to vector<128x128xf32>
    %62 = arith.mulf %60, %61 : vector<128x128xf32>
    %63 = vector.broadcast %49 : vector<1x128xf32> to vector<128x128xf32>
    %64 = vector.broadcast %46 : vector<128x1xf32> to vector<128x128xf32>
    %65 = arith.mulf %63, %64 : vector<128x128xf32>
    %66 = arith.addf %62, %65 : vector<128x128xf32>
    %67 = vector.broadcast %50 : vector<1x128xf32> to vector<128x128xf32>
    %68 = arith.addf %66, %67 : vector<128x128xf32>
    %69 = arith.addf %59, %68 : vector<128x128xf32>
    %70 = arith.truncf %69 : vector<128x128xf32> to vector<128x128xbf16>
    %c0_16 = arith.constant 0 : index
    %c0_17 = arith.constant 0 : index
    %71 = vector.load %arg9[%c0_16, %c0_17] : memref<128x128xbf16, #tpu.memory_space<vmem>>, vector<128x128xbf16>
    tpu.vector_store %arg9[%c0_16, %c0_17], %70 {strides = array<i32>} : memref<128x128xbf16, #tpu.memory_space<vmem>>, vector<128x128xbf16>,
    return
  }
  func.func @transform_0(%arg0: i32, %arg1: memref<3xi32, #tpu.memory_space<smem>>, %arg2: memref<3xi32, #tpu.memory_space<smem>>, %arg3: memref<3xi32, #tpu.memory_space<smem>>, %arg4: memref<3xi32, #tpu.memory_space<smem>>) -> (i32, i32) {
    %c0_i32 = arith.constant 0 : i32
    %c0_i32_0 = arith.constant 0 : i32
    return %arg0, %c0_i32 : i32, i32
  }
  func.func @transform_1(%arg0: i32, %arg1: memref<3xi32, #tpu.memory_space<smem>>, %arg2: memref<3xi32, #tpu.memory_space<smem>>, %arg3: memref<3xi32, #tpu.memory_space<smem>>, %arg4: memref<3xi32, #tpu.memory_space<smem>>) -> (i32, i32, i32) {
    %0 = arith.index_cast %arg0 : i32 to index
    %1 = memref.load %arg1[%0] : memref<3xi32, #tpu.memory_space<smem>>
    %c0_i32 = arith.constant 0 : i32
    %c0_i32_0 = arith.constant 0 : i32
    %c0_i32_1 = arith.constant 0 : i32
    return %1, %c0_i32, %c0_i32_0 : i32, i32, i32
  }
  func.func @transform_2(%arg0: i32, %arg1: memref<3xi32, #tpu.memory_space<smem>>, %arg2: memref<3xi32, #tpu.memory_space<smem>>, %arg3: memref<3xi32, #tpu.memory_space<smem>>, %arg4: memref<3xi32, #tpu.memory_space<smem>>) -> (i32, i32, i32) {
    %0 = arith.index_cast %arg0 : i32 to index
    %1 = memref.load %arg1[%0] : memref<3xi32, #tpu.memory_space<smem>>
    %c0_i32 = arith.constant 0 : i32
    %c0_i32_0 = arith.constant 0 : i32
    %c0_i32_1 = arith.constant 0 : i32
    return %1, %c0_i32, %c0_i32_0 : i32, i32, i32
  }
  func.func @transform_3(%arg0: i32, %arg1: memref<3xi32, #tpu.memory_space<smem>>, %arg2: memref<3xi32, #tpu.memory_space<smem>>, %arg3: memref<3xi32, #tpu.memory_space<smem>>, %arg4: memref<3xi32, #tpu.memory_space<smem>>) -> (i32, i32) {
    %c0_i32 = arith.constant 0 : i32
    %c0_i32_0 = arith.constant 0 : i32
    return %arg0, %c0_i32 : i32, i32
  }
  func.func @transform_4(%arg0: i32, %arg1: memref<3xi32, #tpu.memory_space<smem>>, %arg2: memref<3xi32, #tpu.memory_space<smem>>, %arg3: memref<3xi32, #tpu.memory_space<smem>>, %arg4: memref<3xi32, #tpu.memory_space<smem>>) -> (i32, i32) {
    %c0_i32 = arith.constant 0 : i32
    %c0_i32_0 = arith.constant 0 : i32
    return %arg0, %c0_i32 : i32, i32
  }
}

</mosaic_0001>

<bundles_post_ra>
// kernel: tpu_custom_call.1
= control target key start
LH: loop header
LB: loop body
LE: loop exit
PB: predicated region body
PF: predicated region fallthrough
CT: control target
= control target key end

     0   :  { %s1952_s27 = smov [#allocation3]   ;;  %s3018_s0 = inlined_call_operand.hbm [shape: s32[3], index: 0, kind: input, shape index: {}]   ;;  %s3019_s4 = inlined_call_operand.hbm [shape: bf16[384,128], index: 4, kind: input, shape index: {}]   ;;  %s3020_s5 = inlined_call_operand.hbm [shape: bf16[3,128,128], index: 5, kind: input, shape index: {}]   ;;  %s3021_s6 = inlined_call_operand.hbm [shape: f32[3,8,128], index: 6, kind: input, shape index: {}]   ;;  %s3022_s7 = inlined_call_operand.hbm [shape: f32[384,128], index: 7, kind: output, shape index: {0}]   ;;  %s3023_s8 = inlined_call_operand.hbm [shape: bf16[384,128], index: 8, kind: output, shape index: {1}]   ;;  %s3024_s1 = inlined_call_operand.vmem [shape: s32[3], index: 1, kind: input, shape index: {}]   ;;  %s3025_s2 = inlined_call_operand.vmem [shape: s32[3], index: 2, kind: input, shape index: {}]   ;;  %s3026_s3 = inlined_call_operand.vmem [shape: s32[3], index: 3, kind: input, shape index: {}]  }
   0x1   :  { %3070 = sst [smem:[#allocation46_spill]] %s3019_s4  ;;  %s16_s10 = sshll.u32 %s3024_s1, 4  ;;  %s17_s10 = int_to_ptr.vmem [resolvable:$true] %s16_s10 }
   0x2   :  { %3071 = sst [smem:[#allocation47_spill]] %s3020_s5  ;;  %s20_s13 = sshll.u32 %s3025_s2, 4  ;;  %s21_s13 = int_to_ptr.vmem [resolvable:$true] %s20_s13 }
   0x3   :  { %15 = dma.hbm_to_smem %s3018_s0, 16, %s1952_s27, [#allocation2] }
   0x4   :  { %s1678_s14 = scalar_lea.vmem %s17_s10, 16  ;;  %p1683_p1 = scmp.lt.s32.totalorder %s17_s10, %s17_s10 }
   0x5   :  { %p1679_p0 = scmp.ne.s32.totalorder %s17_s10, %s1678_s14  ;;  %p1684_p2 = scmp.lt.s32.totalorder %s1678_s14, %s1678_s14 }
   0x7   :  { %p1685_p3 = por %p1684_p2, %p1683_p1 }
   0x9   :  { %p1686_p4 = pnand %p1685_p3, %p1679_p0 }
   0xb   :  { %1689 = shalt.err (!%p1686_p4)  }
   0xc   :  { %s1953_s15 = smov [#allocation4]   ;;  %s24_s17 = sshll.u32 %s3026_s3, 4  ;;  %s25_s17 = int_to_ptr.vmem [resolvable:$true] %s24_s17 }
   0xd   :  { %19 = dma.vmem_to_smem %s17_s10, 16, %s1953_s15, [#allocation2] }
   0xe   :  { %s1690_s1 = scalar_lea.vmem %s21_s13, 16  ;;  %p1695_p6 = scmp.lt.s32.totalorder %s21_s13, %s21_s13 }
   0xf   :  { %p1691_p5 = scmp.ne.s32.totalorder %s21_s13, %s1690_s1  ;;  %p1696_p7 = scmp.lt.s32.totalorder %s1690_s1, %s1690_s1 }
  0x11   :  { %p1697_p8 = por %p1696_p7, %p1695_p6 }
  0x13   :  { %p1698_p9 = pnand %p1697_p8, %p1691_p5 }
  0x15   :  { %1701 = shalt.err (!%p1698_p9)  }
  0x16   :  { %s1954_s2 = smov [#allocation5]   ;;  %s1702_s18 = scalar_lea.vmem %s25_s17, 16 }
  0x17   :  { %23 = dma.vmem_to_smem %s21_s13, 16, %s1954_s2, [#allocation2] }
  0x18   :  { %p1703_p10 = scmp.ne.s32.totalorder %s25_s17, %s1702_s18  ;;  %p1707_p11 = scmp.lt.s32.totalorder %s25_s17, %s25_s17 }
  0x19   :  { %p1708_p12 = scmp.lt.s32.totalorder %s1702_s18, %s1702_s18 }
  0x1b   :  { %p1709_p13 = por %p1708_p12, %p1707_p11 }
  0x1d   :  { %p1710_p0 = pnand %p1709_p13, %p1703_p10 }
  0x1f   :  { %1713 = shalt.err (!%p1710_p0)  }
  0x20   :  { %s1955_s19 = smov [#allocation6]  }
  0x21   :  { %27 = dma.vmem_to_smem %s25_s17, 16, %s1955_s19, [#allocation2] }
  0x22   :  { %1890 = dma.done.wait [#allocation2], 64 }
  0x23   :  { %1891 = vsyncadd [#allocation2], 4294967232 }
  0x24   :  { %29 = sfence }
  0x25   :  { %30 = vsyncpa [#allocation8], 0 }
  0x26   :  { %32 = vsyncpa [#allocation8 + $0x1], 0 }
  0x27   :  { %33 = vsyncpa [#allocation11], 0 }
  0x28   :  { %35 = vsyncpa [#allocation11 + $0x1], 0 }
  0x29   :  { %36 = vsyncpa [#allocation9], 0 }
  0x2a   :  { %38 = vsyncpa [#allocation9 + $0x1], 0 }
  0x2b   :  { %39 = vsyncpa [#allocation15], 0 }
  0x2c   :  { %41 = vsyncpa [#allocation15 + $0x1], 0  ;;  %s2024_s3 = smov 0   ;;  %s2026_s20 = smov 0  }
  0x2d   :  { %s2028_s21 = smov 0   ;;  %s2030_s22 = smov 0  }
  0x2e   :  { %s2032_s23 = smov 0   ;;  %s2034_s24 = smov 0  }
  0x2f   :  { %s2036_s25 = smov 0   ;;  %s2038_s26 = smov 0  }
  0x30   :  { %s2040_s27 = smov 0   ;;  %s2042_s28 = smov 0  }
  0x31 LB: > { %3072 = sst [smem:[#allocation26_spill]] %s1922_s21  ;;  %s2073_s29 = sadd.s32 4294967295, %s1950_s28   ;;  %s1950_s28 = sphi %s2042_s28, %s3162_s28   ;;  %s1946_s27 = sphi %s2040_s27, %s3168_s27   ;;  %s1942_s26 = sphi %s2038_s26, %s3174_s26   ;;  %s1938_s25 = sphi %s2036_s25, %s3173_s25   ;;  %s1934_s24 = sphi %s2034_s24, %s3166_s24   ;;  %s1930_s23 = sphi %s2032_s23, %s3172_s23   ;;  %s1926_s22 = sphi %s2030_s22, %s3171_s22   ;;  %s1922_s21 = sphi %s2028_s21, %s3164_s21   ;;  %s1918_s20 = sphi %s2026_s20, %s3170_s20   ;;  %s1914_s3 = sphi %s2024_s3, %s3169_s3  }
  0x32   : > { %3073 = sst [smem:[#allocation27_spill]] %s1934_s24  ;;  %s2076_s30 = sadd.s32 1, %s1950_s28  }
  0x33   : > { %3074 = sst [smem:[#allocation28_spill]] %s1946_s27  ;;  %p3030_p1 = scmp.eq.s32.totalorder %s1950_s28, 0 }
  0x34   : > { %3075 = sst [smem:[#allocation29_spill]] %s2076_s30  ;;  %p3029_p2 = scmp.eq.s32.totalorder %s2073_s29, 0 }
  0x35   : > { %s77_s9 = sld [smem:[#allocation3 + %s1950_s28]]  ;;  %s82_s10 = sadd.s32 1, %s1934_s24 }
  0x36   : > { %s78_s11 = sld [smem:[#allocation3 + %s2076_s30]]  ;;  %p89_p3 = scmp.ne.s32.totalorder %s1934_s24, %s1930_s23 }
  0x37   : > { %p95_p4 = scmp.ne.s32.totalorder %s1930_s23, %s1926_s22  ;;  %p3028_p6 = scmp.lt.s32.totalorder %s1950_s28, 3 }
  0x38   : > { %p2088_p5 = por %p89_p3, %p3030_p1  ;;  %s220_s14 = sand.u32 1, %s1950_s28  }
  0x39   : > { %p2095_p7 = por %p95_p4, %p3029_p2  ;;  %s222_s15 = sand.u32 1, %s1934_s24  }
  0x3a   : > { %s1305_s16 = sshll.u32 %s222_s15, 6  ;;  %p2117_p9 = pnand %p3028_p6, %p2088_p5 }
  0x3b   : > { %s3077_s13 = scalar_select %p2095_p7, 1, 0 }
  0x3c   : > { %s79_s0 = ssub.s32 %s77_s9, %s78_s11  ;;  %s224_s18 = scalar_lea.vmem [#allocation10], %s1305_s16 }
  0x3d   : > { %p80_p8 = scmp.eq.s32.totalorder %s79_s0, 0  ;;  %s232_s19 = sshll.u32 %s224_s18, 4  ;;  %s2121_s19 = int_to_ptr.vmem [resolvable:$true] %s232_s19 }
  0x3e   : > { %s1492_s17 = scalar_select %p2088_p5, [#allocation3], [#allocation16] }
  0x3f   : > { %s2104_s1 = scalar_select %p80_p8, %s1934_s24, %s82_s10  }
  0x40   : > { %s1493_s2 = scalar_select %p2088_p5, %s1950_s28, 0 }
  0x41   : > { %3078 = sst [smem:[#allocation30_spill]] %s2104_s1  ;;  %s3176_s17 = smov (!%p3028_p6, %s1492_s17), [#allocation18] }
  0x42   : > { %s3178_s2 = smov (!%p3028_p6, %s1493_s2), 0  ;;  %p1310_p10 = scmp.ge.s32.totalorder %s1950_s28, 1 }
  0x43   : > { %s225_s9 = sld [smem:[%s3176_s17 + %s3178_s2]]  ;;  %p259_p11 = scmp.lt.s32.totalorder %s1950_s28, 4 }
  0x44   : > { %s3081_s5 = sld [smem:[#allocation47_spill]]  ;;  %s51_s18 = ssub.s32 %s1950_s28, %s2076_s30 }
  0x45   : > { %p2125_p12 = pnand %p1310_p10, %p259_p11  ;;  %s2137_s17 = scalar_lea.sflag [#allocation11], %s220_s14 }
  0x46   : > { %p1716_p0 = pneg %p2117_p9 }
  0x47   : > { %s3080_s10 = scalar_select %p2125_p12, 1, 0 }
  0x49   : > { %s1357_s11 = sshll.u32 %s225_s9, 10 }
  0x4a   : > { %s2133_s12 = scalar_lea.hbm %s3081_s5, %s1357_s11  ;;  %s1719_s15 = scalar_lea.hbm %s3081_s5, 3072 }
  0x4b   : > { %s1714_s2 = scalar_lea.hbm %s2133_s12, 1024  ;;  %p1720_p5 = scmp.lt.s32.totalorder %s2133_s12, %s3081_s5 }
  0x4c   : > { %p1715_p13 = scmp.ne.s32.totalorder %s2133_s12, %s1714_s2  ;;  %p1721_p8 = scmp.lt.s32.totalorder %s1719_s15, %s1714_s2 }
  0x4e   : > { %p1717_p3 = pnand %p1716_p0, %p1715_p13  ;;  %p1722_p10 = por %p1721_p8, %p1720_p5 }
  0x50   : > { %p1718_p4 = pneg %p1717_p3 }
  0x52   : > { %p1723_p11 = pnand %p1722_p10, %p1718_p4 }
  0x54   : > { %1726 = shalt.err (!%p1723_p11)
}
  0x55   : > { %s1727_s14 = scalar_lea.vmem %s2121_s19, 1024  ;;  %s1956_s11 = smov [#allocation10]  }
  0x56   : > { %p1728_p6 = scmp.ne.s32.totalorder %s2121_s19, %s1727_s14  ;;  %s1732_s16 = sshll.u32 %s1956_s11, 4  ;;  %s1733_s16 = int_to_ptr.vmem [resolvable:$false] %s1732_s16 }
  0x57   : > { %s1734_s1 = scalar_lea.vmem %s1733_s16, 2048  ;;  %p1735_p3 = scmp.lt.s32.totalorder %s2121_s19, %s1733_s16 }
  0x58   : > { %p1730_p2 = pnand %p1728_p6, %p1716_p0  ;;  %p1736_p1 = scmp.lt.s32.totalorder %s1734_s1, %s1727_s14 }
  0x5a   : > { %p1731_p13 = pneg %p1730_p2  ;;  %p1737_p7 = por %p1736_p1, %p1735_p3 }
  0x5c   : > { %p1738_p12 = pnand %p1737_p7, %p1731_p13 }
  0x5e   : > { %1741 = shalt.err (!%p1738_p12)
}
  0x5f   : > { %s3032_s24 = smov 64   ;;  %s3033_s15 = smov 4  }
  0x60   : > { %1513 = dma.hbm_to_vmem [thread:$0]  (!%p2117_p9), %s2133_s12, 1024, %s2121_s19, %s2137_s17, %s3032_s24, %s3032_s24, %s3033_s15  }
  0x61   : > { %p52_p1 = scmp.eq.s32.totalorder %s51_s18, 0  ;;  %s54_s2 = sadd.s32 1, %s1946_s27 }
  0x62   : > { %p61_p2 = scmp.ne.s32.totalorder %s1946_s27, %s1942_s26  ;;  %p67_p6 = scmp.ne.s32.totalorder %s1942_s26, %s1938_s25 }
  0x63   : > { %s2170_s9 = scalar_select %p52_p1, %s1946_s27, %s54_s2  }
  0x64   : > { %p3083_p7 = scmp.eq.s32.totalorder %s1950_s28, 0  ;;  %p3084_p0 = scmp.eq.s32.totalorder %s2073_s29, 0 }
  0x65   : > { %3082 = sst [smem:[#allocation31_spill]] %s2170_s9  ;;  %p147_p5 = scmp.eq.s32.totalorder %s2073_s29, 2 }
  0x66   : > { %p63_p12 = por %p3083_p7, %p61_p2  ;;  %p2176_p4 = por %p3084_p0, %p67_p6 }
  0x67   : > { %s3086_s22 = sadd.s32 4294967294, %s1950_s28   ;;  %s199_s14 = sand.u32 1, %s1946_s27  }
  0x68   : > { %s3085_s0 = scalar_select %p2176_p4, 1, 0 }
  0x69   : > { %p153_p8 = scmp.eq.s32.totalorder %s3086_s22, 2  ;;  %s1356_s19 = sshll.u32 %s1950_s28, 10 }
  0x6a   : > { %p2185_p9 = por %p147_p5, %p61_p2  ;;  %s1302_s11 = sshll.u32 %s199_s14, 6 }
  0x6b   : > { %p2189_p10 = por %p153_p8, %p67_p6  ;;  %s3090_s4 = sld [smem:[#allocation46_spill]] }
  0x6c   : > { %s3087_s12 = scalar_select %p2185_p9, 1, 0 }
  0x6d   : > { %s3088_s18 = scalar_select %p2189_p10, 1, 0 }
  0x6e   : > { %s203_s22 = scalar_lea.vmem [#allocation7], %s1302_s11  ;;  %p3091_p11 = scmp.lt.s32.totalorder %s1950_s28, 3 }
  0x6f   : > { %3089 = sst [smem:[#allocation32_spill]] %s3088_s18  ;;  %s210_s24 = sshll.u32 %s203_s22, 4  ;;  %s2204_s24 = int_to_ptr.vmem [resolvable:$true] %s210_s24 }
  0x70   : > { %p2200_p13 = pnand %p3091_p11, %p63_p12  ;;  %s2206_s5 = scalar_lea.sflag [#allocation8], %s199_s14 }
  0x71   : > { %s2196_s2 = scalar_lea.hbm %s3090_s4, %s1356_s19  ;;  %s1747_s11 = scalar_lea.hbm %s3090_s4, 3072 }
  0x72   : > { %s1742_s9 = scalar_lea.hbm %s2196_s2, 1024  ;;  %p1744_p1 = pneg %p2200_p13 }
  0x73   : > { %p1743_p3 = scmp.ne.s32.totalorder %s2196_s2, %s1742_s9  ;;  %p1748_p7 = scmp.lt.s32.totalorder %s2196_s2, %s3090_s4 }
  0x74   : > { %p1749_p12 = scmp.lt.s32.totalorder %s1747_s11, %s1742_s9 }
  0x75   : > { %p1745_p2 = pnand %p1744_p1, %p1743_p3 }
  0x76   : > { %p1750_p0 = por %p1749_p12, %p1748_p7 }
  0x77   : > { %p1746_p6 = pneg %p1745_p2 }
  0x79   : > { %p1751_p5 = pnand %p1750_p0, %p1746_p6 }
  0x7b   : > { %1754 = shalt.err (!%p1751_p5)
}
  0x7c   : > { %s1755_s14 = scalar_lea.vmem %s2204_s24, 1024  ;;  %s1959_s27 = smov [#allocation7]  }
  0x7d   : > { %p1756_p8 = scmp.ne.s32.totalorder %s2204_s24, %s1755_s14  ;;  %s1760_s18 = sshll.u32 %s1959_s27, 4  ;;  %s1761_s18 = int_to_ptr.vmem [resolvable:$false] %s1760_s18 }
  0x7e   : > { %s1762_s19 = scalar_lea.vmem %s1761_s18, 2048  ;;  %p1763_p2 = scmp.lt.s32.totalorder %s2204_s24, %s1761_s18 }
  0x7f   : > { %p1758_p11 = pnand %p1756_p8, %p1744_p1  ;;  %p1764_p10 = scmp.lt.s32.totalorder %s1762_s19, %s1755_s14 }
  0x81   : > { %p1759_p3 = pneg %p1758_p11  ;;  %p1765_p9 = por %p1764_p10, %p1763_p2 }
  0x83   : > { %p1766_p4 = pnand %p1765_p9, %p1759_p3 }
  0x85   : > { %1769 = shalt.err (!%p1766_p4)
}
  0x86   : > { %s3093_s9 = smov 4   ;;  %s3094_s16 = smov 64  }
  0x87   : > { %1508 = dma.hbm_to_vmem [thread:$0]  (!%p2200_p13), %s2196_s2, 1024, %s2204_s24, %s2206_s5, %s3094_s16, %s3094_s16, %s3093_s9  }
  0x88   : > { %s105_s27 = sld [smem:[#allocation3 + %s1950_s28]]  ;;  %p117_p4 = scmp.ne.s32.totalorder %s1922_s21, %s1918_s20 }
  0x89   : > { %s106_s15 = sld [smem:[#allocation3 + %s2076_s30]]  ;;  %p123_p9 = scmp.ne.s32.totalorder %s1918_s20, %s1914_s3 }
  0x8a   : > { %p3095_p10 = scmp.eq.s32.totalorder %s1950_s28, 0  ;;  %p3096_p6 = scmp.eq.s32.totalorder %s2073_s29, 0 }
  0x8b   : > { %s244_s11 = sand.u32 1, %s1922_s21   ;;  %s110_s19 = sadd.s32 1, %s1922_s21 }
  0x8c   : > { %p119_p1 = por %p117_p4, %p3095_p10  ;;  %p2240_p7 = por %p123_p9, %p3096_p6 }
  0x8d   : > { %s1308_s5 = sshll.u32 %s244_s11, 3  ;;  %p3098_p13 = scmp.lt.s32.totalorder %s1950_s28, 3 }
  0x8e   : > { %s3097_s18 = scalar_select %p2240_p7, 1, 0 }
  0x8f   : > { %s1495_s1 = scalar_select %p119_p1, [#allocation3], [#allocation17] }
  0x90   : > { %s1496_s22 = scalar_select %p119_p1, %s1950_s28, 0 }
  0x91   : > { %s107_s14 = ssub.s32 %s105_s27, %s106_s15  ;;  %s3180_s1 = smov (!%p3098_p13, %s1495_s1), [#allocation19] }
  0x92   : > { %p108_p12 = scmp.eq.s32.totalorder %s107_s14, 0  ;;  %p3100_p0 = pmov %p3098_p13 }
  0x93   : > { %s246_s9 = scalar_lea.vmem [#allocation12], %s1308_s5 }
  0x94   : > { %s2250_s24 = scalar_select %p108_p12, %s1922_s21, %s110_s19  }
  0x95   : > { %s3182_s22 = smov (!%p3100_p0, %s1496_s22), 0  ;;  %p3101_p5 = pmov %p3100_p0 }
  0x96   : > { %3099 = sst [smem:[#allocation33_spill]] %s2250_s24  ;;  %s254_s16 = sshll.u32 %s246_s9, 4  ;;  %s255_s16 = int_to_ptr.vmem [resolvable:$true] %s254_s16 }
  0x97   : > { %p2256_p8 = pnand %p3101_p5, %p119_p1  ;;  %s247_s2 = sld [smem:[%s3180_s1 + %s3182_s22]] }
  0x98   : > { %s1775_s21 = scalar_lea.hbm %s3021_s6, 384 }
  0x99   : > { %p1772_p3 = pneg %p2256_p8 }
  0x9d   : > { %s1309_s27 = sshll.u32 %s247_s2, 7 }
  0x9e   : > { %s252_s11 = scalar_lea.hbm %s3021_s6, %s1309_s27 }
  0x9f   : > { %s1770_s4 = scalar_lea.hbm %s252_s11, 128  ;;  %p1776_p9 = scmp.lt.s32.totalorder %s252_s11, %s3021_s6 }
  0xa0   : > { %p1771_p11 = scmp.ne.s32.totalorder %s252_s11, %s1770_s4  ;;  %p1777_p10 = scmp.lt.s32.totalorder %s1775_s21, %s1770_s4 }
  0xa2   : > { %p1773_p2 = pnand %p1772_p3, %p1771_p11  ;;  %p1778_p1 = por %p1777_p10, %p1776_p9 }
  0xa4   : > { %p1774_p4 = pneg %p1773_p2 }
  0xa6   : > { %p1779_p6 = pnand %p1778_p1, %p1774_p4 }
  0xa8   : > { %1782 = shalt.err (!%p1779_p6)
}
  0xa9   : > { %s1783_s22 = scalar_lea.vmem %s255_s16, 128  ;;  %s1960_s5 = smov [#allocation12]  }
  0xaa   : > { %p1784_p12 = scmp.ne.s32.totalorder %s255_s16, %s1783_s22  ;;  %s1788_s2 = sshll.u32 %s1960_s5, 4  ;;  %s1789_s2 = int_to_ptr.vmem [resolvable:$false] %s1788_s2 }
  0xab   : > { %s1790_s9 = scalar_lea.vmem %s1789_s2, 256  ;;  %p1791_p5 = scmp.lt.s32.totalorder %s255_s16, %s1789_s2 }
  0xac   : > { %p1786_p13 = pnand %p1784_p12, %p1772_p3  ;;  %p1792_p11 = scmp.lt.s32.totalorder %s1790_s9, %s1783_s22 }
  0xae   : > { %p1787_p0 = pneg %p1786_p13  ;;  %p1793_p2 = por %p1792_p11, %p1791_p5 }
  0xb0   : > { %p1794_p7 = pnand %p1793_p2, %p1787_p0 }
  0xb2   : > { %1797 = shalt.err (!%p1794_p7)
}
  0xb3   : > { %1518 = dma.hbm_to_vmem [thread:$0]  (!%p2256_p8), %s252_s11, 128, %s255_s16, %s2137_s17  }
  0xb4   : > { %p3103_p4 = scmp.ne.s32.totalorder %s3080_s10, 0 }
  0xb6   : > { %263 = sbr.rel (%p3103_p4) target bundleno = 506 (0x1fa), region = 32 }
  0xbb   : > { %s2277_s4 = sand.u32 1, %s1942_s26   ;;  %p3104_p7 = scmp.ne.s32.totalorder %s3085_s0, 0 }
  0xbc   : > { %s1311_s21 = sshll.u32 %s2277_s4, 6  ;;  %s266_s30 = scalar_lea.sflag [#allocation8], %s2277_s4 }
  0xbd   : > { %s2283_s24 = scalar_lea.vmem [#allocation7], %s1311_s21 }
  0xbe   : > { %1893 = dma.done.wait (%p3104_p7), %s266_s30, 1024  }
  0xbf   : > { %1895 = vsyncadd (%p3104_p7), %s266_s30, 4294966272  ;;  %s274_s10 = sand.u32 1, %s2073_s29   ;;  %s276_s17 = sand.u32 1, %s1930_s23  }
  0xc0   : > { %s1312_s3 = sshll.u32 %s276_s17, 6  ;;  %s275_s16 = scalar_lea.sflag [#allocation11], %s274_s10 }
  0xc1   : > { %s2291_s27 = scalar_lea.vmem [#allocation10], %s1312_s3  ;;  %p3105_p8 = scmp.ne.s32.totalorder %s3077_s13, 0 }
  0xc3   : > { %1897 = dma.done.wait (%p3105_p8), %s275_s16, 1024  }
  0xc4   : > { %1899 = vsyncadd (%p3105_p8), %s275_s16, 4294966272  ;;  %s285_s15 = sand.u32 1, %s1918_s20   ;;  %p3106_p3 = scmp.ne.s32.totalorder %s3097_s18, 0 }
  0xc5   : > { %s2298_s14 = sshll.u32 %s285_s15, 3 }
  0xc6   : > { %s287_s0 = scalar_lea.vmem [#allocation12], %s2298_s14 }
  0xc7   : > { %1901 = dma.done.wait (%p3106_p3), %s275_s16, 128  }
  0xc8   : > { %1903 = vsyncadd (%p3106_p3), %s275_s16, 4294967168  ;;  %s644_s11 = sld [smem:[#allocation5 + %s2073_s29]]  ;;  %v1618_v0 = vld [vmem:[%s2291_s27 + $0x38] sm:$0xff]   ;;  %v1619_v1 = vld [vmem:[%s2291_s27 + $0x30] sm:$0xff]   ;;  %v366_v20 = vlaneseq  ;;  %s1314_s2 = sshll.u32 %s2277_s4, 7 }
  0xc9   : > { %s646_s13 = sld [smem:[#allocation6 + %s2073_s29]]  ;;  %1439 = vmatprep.subr.bf16.mxu0 %v1618_v0  ;;  %1471 = vmatprep.subr.bf16.mxu1 %v1618_v0  ;;  %v1620_v4 = vld [vmem:[%s2291_s27 + $0x28] sm:$0xff]   ;;  %v1621_v5 = vld [vmem:[%s2291_s27 + $0x20] sm:$0xff]   ;;  %v1622_v8 = vld [vmem:[%s2291_s27 + $0x18] sm:$0xff]   ;;  %s2735_s9 = scalar_lea.vmem [#allocation13], %s1314_s2 }
  0xca   : > { %1440 = vmatpush3.bf16.msra.mxu0 %v1618_v0  ;;  %1479 = vmatpush3.bf16.msra.mxu1 %v1618_v0  ;;  %v1626_v6 = vld [vmem:[%s2283_s24] sm:$0xff]   ;;  %v1623_v10 = vld [vmem:[%s2291_s27 + $0x10] sm:$0xff]   ;;  %v1624_v12 = vld [vmem:[%s2291_s27 + $0x8] sm:$0xff]   ;;  %v2329_v21 = vshrl.u32 %v366_v20, 7  ;;  %s643_s18 = sld [smem:[#allocation4 + %s2073_s29]]  ;;  %s1374_s30 = sshll.u32 %s2073_s29, 11 }
  0xcb   : > { %1441 = vmatprep.subr.bf16.mxu0 %v1619_v1  ;;  %1472 = vmatprep.subr.bf16.mxu1 %v1619_v1  ;;  %v1627_v7 = vld [vmem:[%s2283_s24 + $0x20] sm:$0xff]   ;;  %v1628_v14 = vld [vmem:[%s2283_s24 + $0x8] sm:$0xff]   ;;  %v1630_v16 = vld [vmem:[%s2283_s24 + $0x10] sm:$0xff]   ;;  %s2794_s3 = scalar_lea.hbm %s3022_s7, %s1374_s30  ;;  %s1117_s16 = scalar_lea.sflag [#allocation9], %s2277_s4 }
  0xcc   : > { %1455 = vmatprep.mubr.bf16.mxu0 %v1626_v6  ;;  %1463 = vmatprep.mubr.bf16.mxu1 %v1627_v7  ;;  %v1625_v13 = vld [vmem:[%s2291_s27] sm:$0xff]   ;;  %v1629_v15 = vld [vmem:[%s2283_s24 + $0x28] sm:$0xff]   ;;  %v1631_v17 = vld [vmem:[%s2283_s24 + $0x30] sm:$0xff]   ;;  %v368_v22 = vsub.s32 0, %v2329_v21  ;;  %v656_v24 = vadd.s32 8, %v2329_v21  ;;  %v657_v25 = vadd.s32 16, %v2329_v21 }
  0xcd   : > { %v1632_v18 = vld [vmem:[%s2283_s24 + $0x18] sm:$0xff]   ;;  %v2335_v23 = vld [vmem:[%s287_s0] sm:$0xff]  ;;  %v658_v26 = vadd.s32 24, %v2329_v21  ;;  %v661_v28 = vadd.s32 48, %v2329_v21  ;;  %v665_v29 = vadd.s32 80, %v2329_v21  ;;  %v662_v31 = vadd.s32 56, %v2329_v21 }
  0xce   : > { %s645_s19 = scvt.s32.f32 %s644_s11  ;;  %1442 = vmatpush3.bf16.msra.mxu0 %v1619_v1  ;;  %1480 = vmatpush3.bf16.msra.mxu1 %v1619_v1  ;;  %v1633_v19 = vld [vmem:[%s2283_s24 + $0x38] sm:$0xff]   ;;  %v2341_v27 = vrot.slane %v2335_v23, %v368_v22  ;;  %v663_v32 = vadd.s32 64, %v2329_v21  ;;  %v664_v33 = vadd.s32 72, %v2329_v21  ;;  %v666_v34 = vadd.s32 88, %v2329_v21  ;;  %s1135_s24 = sshll.u32 %s2735_s9, 4  ;;  %s2796_s24 = int_to_ptr.vmem [resolvable:$true] %s1135_s24 }
  0xcf   : > { %s647_s1 = scvt.s32.f32 %s646_s13  ;;  %1443 = vmatprep.subr.bf16.mxu0 %v1620_v4  ;;  %1473 = vmatprep.subr.bf16.mxu1 %v1620_v4  ;;  %v669_v35 = vadd.s32 112, %v2329_v21  ;;  %v670_v36 = vadd.s32 120, %v2329_v21  ;;  %v659_v38 = vadd.s32 32, %v2329_v21  ;;  %v660_v42 = vadd.s32 40, %v2329_v21  ;;  %s1798_s27 = scalar_lea.vmem %s2796_s24, 2048 }
  0xd0   : > { %v2309_v2 = vstv %s645_s19  ;;  %3107 = vst [vmem:[#allocation34_spill] sm:$0xff] %v2341_v27  ;;  %v671_v30 = vstv %s643_s18  ;;  %v667_v45 = vadd.s32 96, %v2329_v21  ;;  %v668_v46 = vadd.s32 104, %v2329_v21  ;;  %p1799_p9 = scmp.ne.s32.totalorder %s2796_s24, %s1798_s27  ;;  %p3156_p10 = scmp.ne.s32.totalorder %s3087_s12, 0 }
  0xd1   : > { %1634 = vrcp.f32 %v2309_v2  ;;  %v2312_v3 = vstv %s647_s1  ;;  %v2352_v37 = vadd.s32 %v671_v30, %v2329_v21  ;;  %v2355_v39 = vadd.s32 %v671_v30, %v656_v24  ;;  %s1961_s15 = smov [#allocation13]  }
  0xd2   : > { %1636 = vrcp.f32 %v2312_v3  ;;  %1444 = vmatpush3.bf16.msra.mxu0 %v1620_v4  ;;  %1481 = vmatpush3.bf16.msra.mxu1 %v1620_v4  ;;  %v2357_v40 = vadd.s32 %v671_v30, %v657_v25  ;;  %v2359_v41 = vadd.s32 %v671_v30, %v658_v26  ;;  %v2362_v43 = vadd.s32 %v671_v30, %v661_v28  ;;  %p1800_p1 = pnand %p1799_p9, %p3156_p10  ;;  %s1802_s14 = sshll.u32 %s1961_s15, 4  ;;  %s1803_s14 = int_to_ptr.vmem [resolvable:$false] %s1802_s14 }
  0xd3   : > { %1445 = vmatprep.subr.bf16.mxu0 %v1621_v5  ;;  %1474 = vmatprep.subr.bf16.mxu1 %v1621_v5  ;;  %v2364_v44 = vadd.s32 %v671_v30, %v665_v29  ;;  %v2368_v47 = vadd.s32 %v671_v30, %v662_v31  ;;  %v2370_v48 = vadd.s32 %v671_v30, %v663_v32  ;;  %v3053_v53 = vcvt.s32.f32 %v2352_v37  ;;  %s1804_s0 = scalar_lea.vmem %s1803_s14, 4096  ;;  %p1805_p12 = scmp.lt.s32.totalorder %s2796_s24, %s1803_s14 }
  0xd4   : > { %v2372_v49 = vadd.s32 %v671_v30, %v664_v33  ;;  %v2374_v50 = vadd.s32 %v671_v30, %v666_v34  ;;  %v2376_v51 = vadd.s32 %v671_v30, %v669_v35  ;;  %v2378_v52 = vadd.s32 %v671_v30, %v670_v36  ;;  %p1801_p6 = pneg %p1800_p1  ;;  %p1806_p13 = scmp.lt.s32.totalorder %s1804_s0, %s1798_s27 }
  0xd5   : > { %v2381_v54 = vadd.s32 %v671_v30, %v659_v38  ;;  %v3052_v55 = vcvt.s32.f32 %v2355_v39  ;;  %v3051_v56 = vcvt.s32.f32 %v2357_v40  ;;  %v3050_v57 = vcvt.s32.f32 %v2359_v41 }
  0xd6   : > { %1446 = vmatpush3.bf16.msra.mxu0 %v1621_v5  ;;  %1482 = vmatpush3.bf16.msra.mxu1 %v1621_v5  ;;  %3108 = vst [vmem:[#allocation35_spill] sm:$0xff] %v2376_v51  ;;  %3109 = vst [vmem:[#allocation36_spill] sm:$0xff] %v2378_v52  ;;  %v2386_v58 = vadd.s32 %v671_v30, %v660_v42  ;;  %v3049_v59 = vcvt.s32.f32 %v2362_v43  ;;  %v3045_v60 = vcvt.s32.f32 %v2364_v44  ;;  %v3048_v63 = vcvt.s32.f32 %v2368_v47  ;;  %p1807_p0 = por %p1806_p13, %p1805_p12 }
  0xd7   : > { %1447 = vmatprep.subr.bf16.mxu0 %v1622_v8  ;;  %1475 = vmatprep.subr.bf16.mxu1 %v1622_v8  ;;  %v2390_v61 = vadd.s32 %v671_v30, %v667_v45  ;;  %v2392_v62 = vadd.s32 %v671_v30, %v668_v46  ;;  %v3047_v0 = vcvt.s32.f32 %v2370_v48  ;;  %v3046_v1 = vcvt.s32.f32 %v2372_v49 }
  0xd8   : > { %v3044_v4 = vcvt.s32.f32 %v2374_v50  ;;  %v3043_v5 = vcvt.s32.f32 %v2376_v51  ;;  %v3042_v6 = vcvt.s32.f32 %v2378_v52  ;;  %v704_v7 = vadd.f32 0.5, %v3053_v53  ;;  %p1808_p5 = pnand %p1807_p0, %p1801_p6 }
  0xd9   : > { %v713_v20 = vadd.f32 0.5, %v3046_v1  ;;  %v910_v22 = vsub.s32 6, %v2329_v21  ;;  %v714_v24 = vadd.f32 0.5, %v3045_v60 }
  0xda   : > { %1448 = vmatpush3.bf16.msra.mxu0 %v1622_v8  ;;  %1483 = vmatpush3.bf16.msra.mxu1 %v1622_v8  ;;  %v3057_v8 = vcvt.s32.f32 %v2381_v54  ;;  %v715_v28 = vadd.f32 0.5, %v3044_v4  ;;  %v718_v29 = vadd.f32 0.5, %v3043_v5  ;;  %v719_v30 = vadd.f32 0.5, %v3042_v6 }
  0xdb   : > { %1449 = vmatprep.subr.bf16.mxu0 %v1623_v10  ;;  %1476 = vmatprep.subr.bf16.mxu1 %v1623_v10  ;;  %v2446_v46 = vrot.slane %v2335_v23, %v910_v22 }
  0xdc   : > { %v708_v26 = vadd.f32 0.5, %v3057_v8 }
  0xdd   : > { %3112 = vst [vmem:[#allocation39_spill] sm:$0xff] %v2446_v46 }
  0xde   : > { %v1635_v9 = vpop.eup %1634  ;;  %1450 = vmatpush3.bf16.msra.mxu0 %v1623_v10  ;;  %1484 = vmatpush3.bf16.msra.mxu1 %v1623_v10  ;;  %v706_v10 = vadd.f32 0.5, %v3051_v56 }
  0xdf   : > { %v1637_v11 = vpop.eup %1636  ;;  %1487 = vpush %v1635_v9  ;;  %1451 = vmatprep.subr.bf16.mxu0 %v1624_v12  ;;  %1477 = vmatprep.subr.bf16.mxu1 %v1624_v12  ;;  %v705_v9 = vadd.f32 0.5, %v3052_v55 }
  0xe0   : > { %1489 = vpush %v1637_v11  ;;  %v707_v11 = vadd.f32 0.5, %v3050_v57 }
  0xe2   : > { %1452 = vmatpush3.bf16.msra.mxu0 %v1624_v12  ;;  %1485 = vmatpush3.bf16.msra.mxu1 %v1624_v12  ;;  %v3056_v12 = vcvt.s32.f32 %v2386_v58 }
  0xe3   : > { %1453 = vmatprep.subr.bf16.mxu0 %v1625_v13  ;;  %1478 = vmatprep.subr.bf16.mxu1 %v1625_v13 }
  0xe4   : > { %v709_v31 = vadd.f32 0.5, %v3056_v12 }
  0xe6   : > { %1454 = vmatpush3.bf16.msra.mxu0 %v1625_v13  ;;  %1486 = vmatpush3.bf16.msra.mxu1 %v1625_v13  ;;  %v870_v13 = vsub.s32 1, %v2329_v21 }
  0xe8   : > { %v2436_v32 = vrot.slane %v2335_v23, %v870_v13 }
  0xe9   : > { %1456 = vmatmul.mubr.bf16.vlgmr.msra.gmra.mxu0 %v1628_v14  ;;  %1464 = vmatmul.mubr.bf16.vlgmr.msra.gmra.mxu1 %v1629_v15  ;;  %v890_v14 = vsub.s32 5, %v2329_v21  ;;  %v3055_v15 = vcvt.s32.f32 %v2390_v61 }
  0xea   : > { %1459 = vmatprep.mubr.bf16.mxu0 %v1630_v16  ;;  %1467 = vmatprep.mubr.bf16.mxu1 %v1631_v17  ;;  %v3054_v16 = vcvt.s32.f32 %v2392_v62  ;;  %v710_v17 = vadd.f32 0.5, %v3049_v59  ;;  %3110 = vst [vmem:[#allocation37_spill] sm:$0xff] %v2436_v32 }
  0xeb   : > { %v2439_v33 = vrot.slane %v2335_v23, %v890_v14  ;;  %v716_v34 = vadd.f32 0.5, %v3055_v15 }
  0xec   : > { %v717_v35 = vadd.f32 0.5, %v3054_v16 }
  0xed   : > { %3111 = vst [vmem:[#allocation38_spill] sm:$0xff] %v2439_v33 }
  0xf1   : > { %1460 = vmatmul.mubr.bf16.gmra.mxu0 %v1632_v18  ;;  %1468 = vmatmul.mubr.bf16.gmra.mxu1 %v1633_v19  ;;  %v711_v18 = vadd.f32 0.5, %v3048_v63  ;;  %v712_v19 = vadd.f32 0.5, %v3047_v0 }
 0x110   : > { %s1488_s22 = spop %1487 }
 0x111   : > { %v720_v25 = vstv %s1488_s22  ;;  %s1490_s5 = spop %1489 }
 0x112   : > { %v721_v36 = vmul.f32 %v720_v25, %v704_v7  ;;  %v722_v38 = vmul.f32 %v720_v25, %v705_v9  ;;  %v723_v42 = vmul.f32 %v720_v25, %v706_v10  ;;  %v724_v45 = vmul.f32 %v720_v25, %v707_v11 }
 0x113   : > { %v727_v6 = vmul.f32 %v720_v25, %v710_v17  ;;  %v728_v5 = vmul.f32 %v720_v25, %v711_v18  ;;  %v725_v13 = vmul.f32 %v720_v25, %v708_v26  ;;  %v729_v4 = vmul.f32 %v720_v25, %v712_v19 }
 0x114   : > { %v730_v60 = vmul.f32 %v720_v25, %v713_v20  ;;  %v731_v14 = vmul.f32 %v720_v25, %v714_v24  ;;  %v726_v1 = vmul.f32 %v720_v25, %v709_v31  ;;  %v732_v0 = vmul.f32 %v720_v25, %v715_v28 }
 0x115   : > { %v735_v63 = vmul.f32 %v720_v25, %v718_v29  ;;  %v733_v59 = vmul.f32 %v720_v25, %v716_v34  ;;  %v734_v57 = vmul.f32 %v720_v25, %v717_v35  ;;  %v736_v56 = vmul.f32 %v720_v25, %v719_v30 }
 0x116   : > { %v2448_v55 = vfloor.f32 %v721_v36  ;;  %v2450_v7 = vfloor.f32 %v722_v38  ;;  %v2452_v9 = vfloor.f32 %v723_v42  ;;  %v2454_v10 = vfloor.f32 %v724_v45 }
 0x117   : > { %v2456_v11 = vfloor.f32 %v727_v6  ;;  %v2458_v17 = vfloor.f32 %v728_v5  ;;  %v2460_v18 = vfloor.f32 %v725_v13  ;;  %v2462_v19 = vfloor.f32 %v729_v4 }
 0x118   : > { %3113 = vst [vmem:[#allocation40_spill] sm:$0xff] %v2448_v55  ;;  %3114 = vst [vmem:[#allocation41_spill] sm:$0xff] %v2450_v7  ;;  %v2464_v20 = vfloor.f32 %v730_v60  ;;  %v2466_v22 = vfloor.f32 %v731_v14  ;;  %v2468_v24 = vfloor.f32 %v726_v1  ;;  %v2470_v25 = vfloor.f32 %v732_v0 }
 0x119   : > { %3115 = vst [vmem:[#allocation42_spill] sm:$0xff] %v2452_v9  ;;  %3116 = vst [vmem:[#allocation43_spill] sm:$0xff] %v2456_v11  ;;  %v2472_v26 = vfloor.f32 %v735_v63  ;;  %v2474_v28 = vfloor.f32 %v733_v59  ;;  %v2476_v6 = vfloor.f32 %v734_v57  ;;  %v2478_v5 = vfloor.f32 %v736_v56 }
 0x11a   : > { %3117 = vst [vmem:[#allocation44_spill] sm:$0xff] %v2458_v17  ;;  %v786_v4 = vadd.f32 0.5, %v2448_v55  ;;  %v787_v60 = vadd.f32 0.5, %v2450_v7  ;;  %v788_v29 = vadd.f32 0.5, %v2452_v9  ;;  %v789_v1 = vadd.f32 0.5, %v2454_v10 }
 0x11b   : > { %v792_v0 = vadd.f32 0.5, %v2456_v11  ;;  %v793_v63 = vadd.f32 0.5, %v2458_v17  ;;  %v790_v30 = vadd.f32 0.5, %v2460_v18  ;;  %v794_v59 = vadd.f32 0.5, %v2462_v19 }
 0x11c   : > { %v795_v57 = vadd.f32 0.5, %v2464_v20  ;;  %v802_v56 = vstv %s1490_s5  ;;  %v791_v31 = vadd.f32 0.5, %v2468_v24  ;;  %v796_v34 = vadd.f32 0.5, %v2466_v22 }
 0x11d   : > { %v797_v35 = vadd.f32 0.5, %v2470_v25  ;;  %v798_v36 = vadd.f32 0.5, %v2474_v28  ;;  %v799_v38 = vadd.f32 0.5, %v2476_v6  ;;  %v800_v42 = vadd.f32 0.5, %v2472_v26 }
 0x11e   : > { %v801_v45 = vadd.f32 0.5, %v2478_v5  ;;  %v2496_v13 = vmul.f32 %v802_v56, %v786_v4  ;;  %v946_v14 = vsub.s32 2, %v2329_v21  ;;  %v2499_v53 = vmul.f32 %v802_v56, %v787_v60 }
 0x11f   : > { %v2501_v16 = vmul.f32 %v802_v56, %v788_v29  ;;  %v2503_v15 = vmul.f32 %v802_v56, %v789_v1  ;;  %v807_v12 = vmul.f32 %v802_v56, %v790_v30  ;;  %v2505_v8 = vmul.f32 %v802_v56, %v792_v0 }
 0x120   : > { %v2507_v46 = vmul.f32 %v802_v56, %v793_v63  ;;  %v2509_v32 = vmul.f32 %v802_v56, %v794_v59  ;;  %v808_v33 = vmul.f32 %v802_v56, %v791_v31  ;;  %v2511_v27 = vmul.f32 %v802_v56, %v795_v57 }
 0x121   : > { %v2513_v4 = vmul.f32 %v802_v56, %v796_v34  ;;  %v815_v52 = vmul.f32 %v802_v56, %v798_v36  ;;  %v816_v51 = vmul.f32 %v802_v56, %v799_v38  ;;  %v2515_v60 = vmul.f32 %v802_v56, %v797_v35 }
 0x122   : > { %v2517_v29 = vmul.f32 %v802_v56, %v800_v42  ;;  %v2519_v1 = vmul.f32 %v802_v56, %v801_v45  ;;  %v823_v57 = vfloor.f32 %v807_v12  ;;  %v824_v36 = vfloor.f32 %v808_v33 }
 0x123   : > { %v966_v35 = vsub.s32 3, %v2329_v21  ;;  %v831_v42 = vfloor.f32 %v815_v52  ;;  %v832_v45 = vfloor.f32 %v816_v51  ;;  %v1002_v12 = vsub.s32 4, %v2329_v21 }
 0x124   : > { %3118 = vst [vmem:[#allocation45_spill] sm:$0xff] %v2519_v1  ;;  %v758_v33 = vmul.f32 %v2460_v18, %v2309_v2  ;;  %v840_v34 = vmul.f32 %v823_v57, %v2312_v3  ;;  %v2539_v38 = vrot.slane %v2335_v23, %v946_v14  ;;  %v759_v51 = vmul.f32 %v2468_v24, %v2309_v2 }
 0x125   : > { %v841_v52 = vmul.f32 %v824_v36, %v2312_v3  ;;  %v2545_v30 = vrot.slane %v2335_v23, %v966_v35  ;;  %v754_v21 = vmul.f32 %v2448_v55, %v2309_v2  ;;  %v766_v31 = vmul.f32 %v2474_v28, %v2309_v2 }
 0x126   : > { %v767_v57 = vmul.f32 %v2476_v6, %v2309_v2  ;;  %v848_v14 = vmul.f32 %v831_v42, %v2312_v3  ;;  %v849_v59 = vmul.f32 %v832_v45, %v2312_v3  ;;  %v2556_v63 = vrot.slane %v2335_v23, %v1002_v12 }
 0x127   : > { %v755_v36 = vmul.f32 %v2450_v7, %v2309_v2  ;;  %v756_v35 = vmul.f32 %v2452_v9, %v2309_v2  ;;  %v757_v56 = vmul.f32 %v2454_v10, %v2309_v2  ;;  %v3119_v0 = vcvt.s32.f32 %v2381_v54 }
 0x128   : > { %v856_v1 = vsub.f32 %v2460_v18, %v840_v34  ;;  %v760_v42 = vmul.f32 %v2456_v11, %v2309_v2  ;;  %v761_v23 = vmul.f32 %v2458_v17, %v2309_v2  ;;  %v3120_v45 = vcvt.s32.f32 %v2386_v58 }
 0x129   : > { %v774_v55 = vsub.f32 %v3119_v0, %v758_v33  ;;  %v857_v7 = vsub.f32 %v2468_v24, %v841_v52  ;;  %v762_v9 = vmul.f32 %v2462_v19, %v2309_v2  ;;  %v763_v54 = vmul.f32 %v2464_v20, %v2309_v2 }
 0x12a   : > { %v775_v12 = vsub.f32 %v3120_v45, %v759_v51  ;;  %v3121_v0 = vcvt.s32.f32 %v2390_v61  ;;  %v3122_v34 = vcvt.s32.f32 %v2392_v62  ;;  %v864_v11 = vsub.f32 %v2474_v28, %v848_v14 }
 0x12b   : > { %v865_v17 = vsub.f32 %v2476_v6, %v849_v59  ;;  %v764_v58 = vmul.f32 %v2466_v22, %v2309_v2  ;;  %v765_v24 = vmul.f32 %v2470_v25, %v2309_v2  ;;  %v768_v51 = vmul.f32 %v2472_v26, %v2309_v2 }
 0x12c   : > { %v782_v18 = vsub.f32 %v3121_v0, %v766_v31  ;;  %v783_v33 = vsub.f32 %v3122_v34, %v767_v57  ;;  %v769_v61 = vmul.f32 %v2478_v5, %v2309_v2  ;;  %v952_v31 = vmul.f32 %v2539_v38, %v774_v55 }
 0x12d   : > { %v972_v62 = vmul.f32 %v2545_v30, %v856_v1  ;;  %v3123_v28 = vcvt.s32.f32 %v2352_v37  ;;  %v3124_v6 = vcvt.s32.f32 %v2355_v39  ;;  %v953_v57 = vmul.f32 %v2539_v38, %v775_v12 }
 0x12e   : > { %v973_v14 = vmul.f32 %v2545_v30, %v857_v7  ;;  %v3125_v45 = vcvt.s32.f32 %v2357_v40  ;;  %v3126_v34 = vcvt.s32.f32 %v2359_v41  ;;  %v960_v55 = vmul.f32 %v2539_v38, %v782_v18 }
 0x12f   : > { %v770_v52 = vsub.f32 %v3123_v28, %v754_v21  ;;  %v771_v59 = vsub.f32 %v3124_v6, %v755_v36  ;;  %v961_v1 = vmul.f32 %v2539_v38, %v783_v33  ;;  %v980_v37 = vmul.f32 %v2545_v30, %v864_v11 }
 0x130   : > { %v772_v0 = vsub.f32 %v3125_v45, %v756_v35  ;;  %v773_v2 = vsub.f32 %v3126_v34, %v757_v56  ;;  %v981_v21 = vmul.f32 %v2545_v30, %v865_v17  ;;  %v3127_v39 = vcvt.s32.f32 %v2362_v43  ;;  %v3133_v17 = vld [vmem:[#allocation35_spill] sm:$0xff]  ;;  %v3135_v34 = vld [vmem:[#allocation36_spill] sm:$0xff] }
 0x131   : > { %v3128_v12 = vcvt.s32.f32 %v2368_v47  ;;  %v3129_v40 = vcvt.s32.f32 %v2370_v48  ;;  %v3130_v41 = vcvt.s32.f32 %v2372_v49  ;;  %v988_v28 = vadd.f32 %v972_v62, %v952_v31 }
 0x132   : > { %v776_v36 = vsub.f32 %v3127_v39, %v760_v42  ;;  %v3131_v18 = vcvt.s32.f32 %v2364_v44  ;;  %v3132_v11 = vcvt.s32.f32 %v2374_v50  ;;  %v3134_v45 = vcvt.s32.f32 %v3133_v17  ;;  %v3152_v17 = vld [vmem:[#allocation42_spill] sm:$0xff] }
 0x133   : > { %v777_v7 = vsub.f32 %v3128_v12, %v761_v23  ;;  %v778_v35 = vsub.f32 %v3129_v40, %v762_v9  ;;  %v779_v56 = vsub.f32 %v3130_v41, %v763_v54  ;;  %v989_v42 = vadd.f32 %v973_v14, %v953_v57  ;;  %v3150_v40 = vld [vmem:[#allocation40_spill] sm:$0xff]  ;;  %v3151_v41 = vld [vmem:[#allocation41_spill] sm:$0xff] }
 0x134   : > { %v780_v33 = vsub.f32 %v3131_v18, %v764_v58  ;;  %v781_v6 = vsub.f32 %v3132_v11, %v765_v24  ;;  %v784_v43 = vsub.f32 %v3134_v45, %v768_v51  ;;  %v3136_v47 = vcvt.s32.f32 %v3135_v34  ;;  %v3153_v34 = vld [vmem:[#allocation43_spill] sm:$0xff] }
 0x135   : > { %v3137_v48 = vfloor.f32 %v2496_v13  ;;  %v3138_v49 = vfloor.f32 %v2499_v53  ;;  %v996_v44 = vadd.f32 %v980_v37, %v960_v55  ;;  %v997_v58 = vadd.f32 %v981_v21, %v961_v1 }
 0x136   : > { %v785_v23 = vsub.f32 %v3136_v47, %v769_v61  ;;  %v3139_v50 = vfloor.f32 %v2501_v16  ;;  %v3140_v51 = vfloor.f32 %v2503_v15  ;;  %v3141_v61 = vfloor.f32 %v2505_v8  ;;  %v3154_v47 = vld [vmem:[#allocation44_spill] sm:$0xff] }
 0x137   : > { %v836_v9 = vmul.f32 %v3137_v48, %v2312_v3  ;;  %v837_v54 = vmul.f32 %v3138_v49, %v2312_v3  ;;  %v3142_v13 = vfloor.f32 %v2507_v46  ;;  %v3143_v53 = vfloor.f32 %v2509_v32  ;;  %v3148_v32 = vld [vmem:[#allocation45_spill] sm:$0xff] }
 0x138   : > { %v838_v24 = vmul.f32 %v3139_v50, %v2312_v3  ;;  %v839_v31 = vmul.f32 %v3140_v51, %v2312_v3  ;;  %v842_v62 = vmul.f32 %v3141_v61, %v2312_v3  ;;  %v3144_v16 = vfloor.f32 %v2511_v27 }
 0x139   : > { %v843_v57 = vmul.f32 %v3142_v13, %v2312_v3  ;;  %v844_v14 = vmul.f32 %v3143_v53, %v2312_v3  ;;  %v3145_v15 = vfloor.f32 %v2513_v4  ;;  %v3146_v8 = vfloor.f32 %v2515_v60 }
 0x13a   : > { %v845_v55 = vmul.f32 %v3144_v16, %v2312_v3  ;;  %v3147_v46 = vfloor.f32 %v2517_v29  ;;  %v3149_v39 = vfloor.f32 %v3148_v32  ;;  %v2665_v27 = vadd.f32 %v2556_v63, %v988_v28 }
 0x13b   : > { %v846_v1 = vmul.f32 %v3145_v15, %v2312_v3  ;;  %v847_v37 = vmul.f32 %v3146_v8, %v2312_v3  ;;  %v2668_v4 = vadd.f32 %v2556_v63, %v989_v42  ;;  %v852_v60 = vsub.f32 %v3150_v40, %v836_v9 }
 0x13c   : > { %v2657_v21 = vmul.f32 %v3147_v46, %v2312_v3  ;;  %v2662_v12 = vmul.f32 %v3149_v39, %v2312_v3  ;;  %v853_v18 = vsub.f32 %v3151_v41, %v837_v54  ;;  %v2673_v11 = vadd.f32 %v2556_v63, %v996_v44 }
 0x13d   : > { %v2676_v29 = vadd.f32 %v2556_v63, %v997_v58  ;;  %v854_v45 = vsub.f32 %v3152_v17, %v838_v24  ;;  %v855_v3 = vsub.f32 %v2454_v10, %v839_v31  ;;  %v858_v28 = vsub.f32 %v3153_v34, %v842_v62 }
 0x13e   : > { %v859_v48 = vsub.f32 %v3154_v47, %v843_v57  ;;  %v860_v42 = vsub.f32 %v2462_v19, %v844_v14  ;;  %v861_v9 = vsub.f32 %v2464_v20, %v845_v55  ;;  %v862_v49 = vsub.f32 %v2466_v22, %v846_v1 }
 0x13f   : > { %v863_v54 = vsub.f32 %v2470_v25, %v847_v37  ;;  %v866_v44 = vsub.f32 %v2472_v26, %v2657_v21  ;;  %v867_v58 = vsub.f32 %v2478_v5, %v2662_v12  ;;  %v948_v10 = vmul.f32 %v2539_v38, %v770_v52 }
 0x140   : > { %v949_v50 = vmul.f32 %v2539_v38, %v771_v59  ;;  %v2694_v24 = vmul.f32 %v2539_v38, %v772_v0  ;;  %v2697_v19 = vmul.f32 %v2539_v38, %v773_v2  ;;  %v2700_v20 = vmul.f32 %v2539_v38, %v776_v36 }
 0x141   : > { %v2703_v22 = vmul.f32 %v2539_v38, %v777_v7  ;;  %v2706_v25 = vmul.f32 %v2539_v38, %v778_v35  ;;  %v2709_v26 = vmul.f32 %v2539_v38, %v779_v56  ;;  %v2712_v59 = vmul.f32 %v2539_v38, %v780_v33  ;;  %v3155_v7 = vld [vmem:[#allocation34_spill] sm:$0xff] }
 0x142   : > { %v2715_v0 = vmul.f32 %v2539_v38, %v781_v6  ;;  %v2718_v2 = vmul.f32 %v2539_v38, %v784_v43  ;;  %v2721_v36 = vmul.f32 %v2539_v38, %v785_v23  ;;  %v968_v56 = vmul.f32 %v2545_v30, %v852_v60 }
 0x143   : > { %v969_v31 = vmul.f32 %v2545_v30, %v853_v18  ;;  %v970_v62 = vmul.f32 %v2545_v30, %v854_v45  ;;  %v971_v6 = vmul.f32 %v2545_v30, %v855_v3  ;;  %v2730_v43 = vmul.f32 %v2545_v30, %v858_v28 }
 0x144   : > { %v2733_v38 = vmul.f32 %v2545_v30, %v859_v48  ;;  %v2742_v55 = vmul.f32 %v2545_v30, %v860_v42  ;;  %v2745_v15 = vmul.f32 %v2545_v30, %v861_v9  ;;  %v2748_v1 = vmul.f32 %v2545_v30, %v862_v49 }
 0x145   : > { %v2751_v8 = vmul.f32 %v2545_v30, %v863_v54  ;;  %v2758_v40 = vmul.f32 %v2545_v30, %v866_v44  ;;  %v2761_v60 = vmul.f32 %v2545_v30, %v867_v58  ;;  %v984_v28 = vadd.f32 %v968_v56, %v948_v10 }
 0x146   : > { %v985_v47 = vadd.f32 %v969_v31, %v949_v50  ;;  %v2772_v44 = vadd.f32 %v970_v62, %v2694_v24  ;;  %v2775_v58 = vadd.f32 %v971_v6, %v2697_v19  ;;  %v990_v19 = vadd.f32 %v2730_v43, %v2700_v20 }
 0x147   : > { %v992_v20 = vadd.f32 %v2742_v55, %v2706_v25  ;;  %v994_v25 = vadd.f32 %v2748_v1, %v2712_v59 }
 0x1a9   : > { %v1457_v5 = vpop.f32.mrf.mxu0  ;;  %v1465_v52 = vpop.f32.mrf.mxu1 }
 0x1aa   : > { %v509_v35 = vadd.f32 %v1457_v5, %v3155_v7  ;;  %v541_v51 = vadd.f32 %v1465_v52, %v3155_v7 }
 0x1ab   : > { %v500_v61 = vpop.f32.mrf.mxu0  ;;  %v532_v33 = vpop.f32.mrf.mxu1 }
 0x1ac   : > { %565 = vst [vmem:[%s2735_s9 + $0x10] sm:$0xff] %v509_v35  ;;  %v581_v23 = vmul.f32 0.5, %v509_v35  ;;  %573 = vst [vmem:[%s2735_s9 + $0x50] sm:$0xff] %v541_v51  ;;  %v589_v13 = vmul.f32 0.5, %v541_v51  ;;  %v501_v57 = vadd.f32 %v500_v61, %v3155_v7  ;;  %v533_v53 = vadd.f32 %v532_v33, %v3155_v7 }
 0x1ad   : > { %v1458_v14 = vpop.f32.mrf.mxu0  ;;  %v1466_v16 = vpop.f32.mrf.mxu1  ;;  %v991_v51 = vadd.f32 %v2733_v38, %v2703_v22  ;;  %v993_v22 = vadd.f32 %v2745_v15, %v2709_v26  ;;  %v995_v26 = vadd.f32 %v2751_v8, %v2715_v0 }
 0x1ae   : > { %1638 = vtanh.f32 %v581_v23  ;;  %563 = vst [vmem:[%s2735_s9] sm:$0xff] %v501_v57  ;;  %v579_v37 = vmul.f32 0.5, %v501_v57  ;;  %571 = vst [vmem:[%s2735_s9 + $0x40] sm:$0xff] %v533_v53  ;;  %v587_v46 = vmul.f32 0.5, %v533_v53  ;;  %v512_v21 = vadd.f32 %v1458_v14, %v3155_v7 }
 0x1af   : > { %1640 = vtanh.f32 %v589_v13  ;;  %v544_v32 = vadd.f32 %v1466_v16, %v3155_v7  ;;  %v503_v39 = vpop.f32.mrf.mxu0  ;;  %v535_v12 = vpop.f32.mrf.mxu1  ;;  %v998_v57 = vadd.f32 %v2758_v40, %v2718_v2  ;;  %v999_v53 = vadd.f32 %v2761_v60, %v2721_v36 }
 0x1b0   : > { %1642 = vtanh.f32 %v579_v37  ;;  %566 = vst [vmem:[%s2735_s9 + $0x18] sm:$0xff] %v512_v21  ;;  %v582_v41 = vmul.f32 0.5, %v512_v21  ;;  %v504_v18 = vadd.f32 %v503_v39, %v3155_v7  ;;  %v536_v17 = vadd.f32 %v535_v12, %v3155_v7 }
 0x1b1   : > { %1644 = vtanh.f32 %v587_v46  ;;  %574 = vst [vmem:[%s2735_s9 + $0x58] sm:$0xff] %v544_v32  ;;  %v590_v45 = vmul.f32 0.5, %v544_v32  ;;  %v1461_v3 = vpop.f32.mrf.mxu0  ;;  %v1469_v34 = vpop.f32.mrf.mxu1  ;;  %v2820_v14 = vadd.f32 %v2556_v63, %v985_v47 }
 0x1b2   : > { %1646 = vtanh.f32 %v582_v41  ;;  %564 = vst [vmem:[%s2735_s9 + $0x8] sm:$0xff] %v504_v18  ;;  %v580_v30 = vmul.f32 0.5, %v504_v18  ;;  %572 = vst [vmem:[%s2735_s9 + $0x48] sm:$0xff] %v536_v17  ;;  %v588_v48 = vmul.f32 0.5, %v536_v17  ;;  %v525_v42 = vadd.f32 %v1461_v3, %v3155_v7 }
 0x1b3   : > { %1648 = vtanh.f32 %v590_v45  ;;  %v557_v9 = vadd.f32 %v1469_v34, %v3155_v7  ;;  %v516_v49 = vpop.f32.mrf.mxu0  ;;  %v548_v54 = vpop.f32.mrf.mxu1 }
 0x1b4   : > { %1650 = vtanh.f32 %v580_v30  ;;  %569 = vst [vmem:[%s2735_s9 + $0x30] sm:$0xff] %v525_v42  ;;  %v585_v10 = vmul.f32 0.5, %v525_v42  ;;  %v517_v50 = vadd.f32 %v516_v49, %v3155_v7  ;;  %v549_v5 = vadd.f32 %v548_v54, %v3155_v7 }
 0x1b5   : > { %1652 = vtanh.f32 %v588_v48  ;;  %577 = vst [vmem:[%s2735_s9 + $0x70] sm:$0xff] %v557_v9  ;;  %v593_v52 = vmul.f32 0.5, %v557_v9  ;;  %v1462_v35 = vpop.f32.mrf.mxu0  ;;  %v1470_v24 = vpop.f32.mrf.mxu1 }
 0x1b6   : > { %1654 = vtanh.f32 %v585_v10  ;;  %567 = vst [vmem:[%s2735_s9 + $0x20] sm:$0xff] %v517_v50  ;;  %v583_v56 = vmul.f32 0.5, %v517_v50  ;;  %575 = vst [vmem:[%s2735_s9 + $0x60] sm:$0xff] %v549_v5  ;;  %v591_v31 = vmul.f32 0.5, %v549_v5  ;;  %v528_v61 = vadd.f32 %v1462_v35, %v3155_v7 }
 0x1b7   : > { %1656 = vtanh.f32 %v593_v52  ;;  %v560_v33 = vadd.f32 %v1470_v24, %v3155_v7  ;;  %v519_v62 = vpop.f32.mrf.mxu0  ;;  %v551_v6 = vpop.f32.mrf.mxu1 }
 0x1b8   : > { %1658 = vtanh.f32 %v583_v56  ;;  %570 = vst [vmem:[%s2735_s9 + $0x38] sm:$0xff] %v528_v61  ;;  %v586_v43 = vmul.f32 0.5, %v528_v61  ;;  %v520_v38 = vadd.f32 %v519_v62, %v3155_v7  ;;  %v552_v23 = vadd.f32 %v551_v6, %v3155_v7 }
 0x1b9   : > { %1660 = vtanh.f32 %v591_v31  ;;  %578 = vst [vmem:[%s2735_s9 + $0x78] sm:$0xff] %v560_v33  ;;  %v594_v13 = vmul.f32 0.5, %v560_v33  ;;  %v2817_v7 = vadd.f32 %v2556_v63, %v984_v28 }
 0x1ba   : > { %568 = vst [vmem:[%s2735_s9 + $0x28] sm:$0xff] %v520_v38  ;;  %576 = vst [vmem:[%s2735_s9 + $0x68] sm:$0xff] %v552_v23 }
 0x1bb   : > { %v1639_v16 = vpop.eup %1638 }
 0x1bc   : > { %1811 = shalt.err (!%p1808_p5)
}
 0x1bd   : > { %s1812_s11 = scalar_lea.hbm %s2794_s3, 2048  ;;  %s1816_s1 = scalar_lea.hbm %s3022_s7, 6144 }
 0x1be   : > { %p1813_p11 = scmp.ne.s32.totalorder %s2794_s3, %s1812_s11  ;;  %p1817_p7 = scmp.lt.s32.totalorder %s2794_s3, %s3022_s7 }
 0x1bf   : > { %p1818_p8 = scmp.lt.s32.totalorder %s1816_s1, %s1812_s11 }
 0x1c0   : > { %p1814_p2 = pnand %p1813_p11, %p3156_p10 }
 0x1c1   : > { %p1819_p3 = por %p1818_p8, %p1817_p7 }
 0x1c2   : > { %p1815_p4 = pneg %p1814_p2 }
 0x1c4   : > { %p1820_p9 = pnand %p1819_p3, %p1815_p4 }
 0x1c6   : > { %1823 = shalt.err (!%p1820_p9)
}
 0x1c7   : > { %s1962_s5 = smov 128   ;;  %s1963_s2 = smov 8   ;;  %v2847_v59 = vadd.f32 %v2556_v63, %v2772_v44  ;;  %v2851_v0 = vadd.f32 %v2556_v63, %v2775_v58  ;;  %v2854_v2 = vadd.f32 %v2556_v63, %v990_v19  ;;  %v2857_v36 = vadd.f32 %v2556_v63, %v991_v51  ;;  %v1641_v55 = vpop.eup %1640  ;;  %v3157_v47 = vld [vmem:[#allocation38_spill] sm:$0xff]  ;;  %v3158_v10 = vld [vmem:[#allocation37_spill] sm:$0xff]  ;;  %v3159_v5 = vld [vmem:[#allocation39_spill] sm:$0xff] }
 0x1c8   : > { %1501 = dma.vmem_to_hbm [thread:$0]  (%p3156_p10), %s2796_s24, 2048, %s2794_s3, %s1117_s16, %s1962_s5, %s1962_s5, %s1963_s2   ;;  %v613_v15 = vmul.f32 0.5, %v1639_v16  ;;  %1662 = vtanh.f32 %v586_v43  ;;  %v584_v1 = vmul.f32 0.5, %v520_v38  ;;  %v2860_v8 = vadd.f32 %v2556_v63, %v992_v20  ;;  %v1643_v37 = vpop.eup %1642 }
 0x1c9   : > { %v621_v46 = vmul.f32 0.5, %v1641_v55  ;;  %1664 = vtanh.f32 %v594_v13  ;;  %v592_v21 = vmul.f32 0.5, %v552_v23  ;;  %v2863_v32 = vadd.f32 %v2556_v63, %v993_v22  ;;  %v1645_v39 = vpop.eup %1644  ;;  %s1375_s9 = sshll.u32 %s2073_s29, 10  ;;  %s326_s30 = scalar_lea.vmem [#allocation14], %s1311_s21 }
 0x1ca   : > { %v629_v12 = vadd.f32 0.5, %v613_v15  ;;  %v611_v40 = vmul.f32 0.5, %v1643_v37  ;;  %v2866_v60 = vadd.f32 %v2556_v63, %v994_v25  ;;  %v2869_v41 = vadd.f32 %v2556_v63, %v995_v26  ;;  %v1647_v18 = vpop.eup %1646  ;;  %s1151_s24 = sshll.u32 %s326_s30, 4  ;;  %s2956_s10 = scalar_lea.hbm %s3023_s8, %s1375_s9  ;;  %s2958_s24 = int_to_ptr.vmem [resolvable:$true] %s1151_s24 }
 0x1cb   : > { %v637_v17 = vadd.f32 0.5, %v621_v46  ;;  %v619_v45 = vmul.f32 0.5, %v1645_v39  ;;  %v2872_v3 = vadd.f32 %v2556_v63, %v998_v57  ;;  %v2875_v34 = vadd.f32 %v2556_v63, %v999_v53  ;;  %v1649_v28 = vpop.eup %1648  ;;  %s1122_s17 = scalar_lea.sflag [#allocation15], %s2277_s4  ;;  %s1824_s3 = scalar_lea.vmem %s2958_s24, 1024 }
 0x1cc   : > { %v894_v30 = vmul.f32 %v3157_v47, %v629_v12  ;;  %v627_v48 = vadd.f32 0.5, %v611_v40  ;;  %v614_v42 = vmul.f32 0.5, %v1647_v18  ;;  %1666 = vtanh.f32 %v584_v1  ;;  %v1651_v9 = vpop.eup %1650  ;;  %p1825_p1 = scmp.ne.s32.totalorder %s2958_s24, %s1824_s3  ;;  %s1964_s16 = smov [#allocation14]  }
 0x1cd   : > { %v902_v49 = vmul.f32 %v3157_v47, %v637_v17  ;;  %v635_v54 = vadd.f32 0.5, %v619_v45  ;;  %v622_v44 = vmul.f32 0.5, %v1649_v28  ;;  %1668 = vtanh.f32 %v592_v21  ;;  %v1653_v58 = vpop.eup %1652  ;;  %s1828_s27 = sshll.u32 %s1964_s16, 4  ;;  %s1829_s27 = int_to_ptr.vmem [resolvable:$false] %s1828_s27 }
 0x1ce   : > { %v874_v50 = vmul.f32 %v3158_v10, %v629_v12  ;;  %v914_v52 = vadd.f32 %v3159_v5, %v894_v30  ;;  %v892_v63 = vmul.f32 %v3157_v47, %v627_v48  ;;  %v630_v35 = vadd.f32 0.5, %v614_v42  ;;  %v1655_v24 = vpop.eup %1654  ;;  %p1826_p6 = pnand %p1825_p1, %p3156_p10  ;;  %s1830_s15 = scalar_lea.vmem %s1829_s27, 2048 }
 0x1cf   : > { %v882_v19 = vmul.f32 %v3158_v10, %v637_v17  ;;  %v922_v51 = vadd.f32 %v3159_v5, %v902_v49  ;;  %v900_v56 = vmul.f32 %v3157_v47, %v635_v54  ;;  %v638_v31 = vadd.f32 0.5, %v622_v44  ;;  %v1657_v61 = vpop.eup %1656  ;;  %p1831_p13 = scmp.lt.s32.totalorder %s2958_s24, %s1829_s27  ;;  %p1832_p0 = scmp.lt.s32.totalorder %s1830_s15, %s1824_s3 }
 0x1d0   : > { %v872_v33 = vmul.f32 %v3158_v10, %v627_v48  ;;  %v912_v62 = vadd.f32 %v3159_v5, %v892_v63  ;;  %v880_v6 = vmul.f32 %v3158_v10, %v635_v54  ;;  %v895_v20 = vmul.f32 %v3157_v47, %v630_v35  ;;  %v1659_v22 = vpop.eup %1658  ;;  %p1827_p12 = pneg %p1826_p6 }
 0x1d1   : > { %v2889_v43 = vmul.f32 %v914_v52, %v874_v50  ;;  %v920_v38 = vadd.f32 %v3159_v5, %v900_v56  ;;  %v875_v23 = vmul.f32 %v3158_v10, %v630_v35  ;;  %v903_v13 = vmul.f32 %v3157_v47, %v638_v31  ;;  %v1661_v25 = vpop.eup %1660  ;;  %p1833_p5 = por %p1832_p0, %p1831_p13 }
 0x1d2   : > { %v2894_v26 = vmul.f32 %v922_v51, %v882_v19  ;;  %v915_v57 = vadd.f32 %v3159_v5, %v895_v20  ;;  %v612_v53 = vmul.f32 0.5, %v1651_v9  ;;  %v620_v16 = vmul.f32 0.5, %v1653_v58 }
 0x1d3   : > { %v928_v55 = vmul.f32 %v912_v62, %v872_v33  ;;  %v883_v15 = vmul.f32 %v3158_v10, %v638_v31  ;;  %v617_v1 = vmul.f32 0.5, %v1655_v24  ;;  %v625_v37 = vmul.f32 0.5, %v1657_v61  ;;  %p1834_p11 = pnand %p1833_p5, %p1827_p12 }
 0x1d4   : > { %v2898_v46 = vmul.f32 %v920_v38, %v880_v6  ;;  %v628_v21 = vadd.f32 0.5, %v612_v53  ;;  %v636_v39 = vadd.f32 0.5, %v620_v16  ;;  %v615_v12 = vmul.f32 0.5, %v1659_v22 }
 0x1d5   : > { %v1663_v40 = vpop.eup %1662  ;;  %v923_v18 = vadd.f32 %v3159_v5, %v903_v13  ;;  %v633_v17 = vadd.f32 0.5, %v617_v1  ;;  %v641_v45 = vadd.f32 0.5, %v625_v37  ;;  %v623_v28 = vmul.f32 0.5, %v1661_v25 }
 0x1d6   : > { %v1665_v30 = vpop.eup %1664  ;;  %v931_v48 = vmul.f32 %v915_v57, %v875_v23  ;;  %v873_v42 = vmul.f32 %v3158_v10, %v628_v21  ;;  %v893_v9 = vmul.f32 %v3157_v47, %v628_v21  ;;  %v901_v49 = vmul.f32 %v3157_v47, %v636_v39 }
 0x1d7   : > { %v881_v54 = vmul.f32 %v3158_v10, %v636_v39  ;;  %v878_v44 = vmul.f32 %v3158_v10, %v633_v17  ;;  %v898_v58 = vmul.f32 %v3157_v47, %v633_v17  ;;  %v906_v50 = vmul.f32 %v3157_v47, %v641_v45 }
 0x1d8   : > { %v913_v52 = vadd.f32 %v3159_v5, %v893_v9  ;;  %v921_v63 = vadd.f32 %v3159_v5, %v901_v49  ;;  %v631_v35 = vadd.f32 0.5, %v615_v12  ;;  %v639_v24 = vadd.f32 0.5, %v623_v28 }
 0x1d9   : > { %v1667_v19 = vpop.eup %1666  ;;  %v918_v51 = vadd.f32 %v3159_v5, %v898_v58  ;;  %v926_v56 = vadd.f32 %v3159_v5, %v906_v50  ;;  %v618_v31 = vmul.f32 0.5, %v1663_v40  ;;  %v626_v61 = vmul.f32 0.5, %v1665_v30 }
 0x1da   : > { %v1669_v33 = vpop.eup %1668  ;;  %v939_v62 = vmul.f32 %v923_v18, %v883_v15  ;;  %v929_v6 = vmul.f32 %v913_v52, %v873_v42  ;;  %v886_v20 = vmul.f32 %v3158_v10, %v641_v45  ;;  %v896_v22 = vmul.f32 %v3157_v47, %v631_v35 }
 0x1db   : > { %v937_v38 = vmul.f32 %v921_v63, %v881_v54  ;;  %v934_v23 = vmul.f32 %v918_v51, %v878_v44  ;;  %v876_v13 = vmul.f32 %v3158_v10, %v631_v35  ;;  %v904_v25 = vmul.f32 %v3157_v47, %v639_v24 }
 0x1dc   : > { %v916_v57 = vadd.f32 %v3159_v5, %v896_v22  ;;  %v634_v53 = vadd.f32 0.5, %v618_v31  ;;  %v642_v16 = vadd.f32 0.5, %v626_v61  ;;  %v616_v1 = vmul.f32 0.5, %v1667_v19 }
 0x1dd   : > { %v942_v37 = vmul.f32 %v926_v56, %v886_v20  ;;  %v884_v21 = vmul.f32 %v3158_v10, %v639_v24  ;;  %v924_v15 = vadd.f32 %v3159_v5, %v904_v25  ;;  %v624_v39 = vmul.f32 0.5, %v1669_v33 }
 0x1de   : > { %v932_v12 = vmul.f32 %v916_v57, %v876_v13  ;;  %v899_v40 = vmul.f32 %v3157_v47, %v634_v53  ;;  %v1020_v18 = vadd.f32 %v2817_v7, %v928_v55  ;;  %v1021_v17 = vadd.f32 %v2820_v14, %v929_v6 }
 0x1df   : > { %v879_v45 = vmul.f32 %v3158_v10, %v634_v53  ;;  %v907_v28 = vmul.f32 %v3157_v47, %v642_v16  ;;  %v632_v30 = vadd.f32 0.5, %v616_v1  ;;  %v640_v42 = vadd.f32 0.5, %v624_v39 }
 0x1e0   : > { %v940_v9 = vmul.f32 %v924_v15, %v884_v21  ;;  %v919_v49 = vadd.f32 %v3159_v5, %v899_v40  ;;  %v887_v54 = vmul.f32 %v3158_v10, %v642_v16  ;;  %v1022_v44 = vadd.f32 %v2847_v59, %v2889_v43 }
 0x1e1   : > { %v927_v58 = vadd.f32 %v3159_v5, %v907_v28  ;;  %v877_v7 = vmul.f32 %v3158_v10, %v632_v30  ;;  %v897_v14 = vmul.f32 %v3157_v47, %v632_v30  ;;  %v1023_v55 = vadd.f32 %v2851_v0, %v931_v48 }
 0x1e2   : > { %v935_v50 = vmul.f32 %v919_v49, %v879_v45  ;;  %v885_v52 = vmul.f32 %v3158_v10, %v640_v42  ;;  %v905_v63 = vmul.f32 %v3157_v47, %v640_v42  ;;  %v1026_v35 = vadd.f32 %v2854_v2, %v934_v23 }
 0x1e3   : > { %v943_v24 = vmul.f32 %v927_v58, %v887_v54  ;;  %v917_v19 = vadd.f32 %v3159_v5, %v897_v14  ;;  %v1028_v59 = vadd.f32 %v2860_v8, %v2898_v46  ;;  %v1029_v43 = vadd.f32 %v2863_v32, %v937_v38 }
 0x1e4   : > { %v925_v51 = vadd.f32 %v3159_v5, %v905_v63  ;;  %v1027_v0 = vadd.f32 %v2857_v36, %v935_v50  ;;  %v1030_v10 = vadd.f32 %v2866_v60, %v2894_v26  ;;  %v1031_v47 = vadd.f32 %v2869_v41, %v939_v62 }
 0x1e5   : > { %v933_v2 = vmul.f32 %v917_v19, %v877_v7  ;;  %v1034_v48 = vadd.f32 %v2872_v3, %v942_v37  ;;  %v1035_v56 = vadd.f32 %v2875_v34, %v943_v24  ;;  %v1379_v31 = vpack.c.bf16 %v1021_v17, %v1020_v18 }
 0x1e6   : > { %v941_v61 = vmul.f32 %v925_v51, %v885_v52  ;;  %v1384_v33 = vpack.c.bf16 %v1023_v55, %v1022_v44  ;;  %v1394_v8 = vpack.c.bf16 %v1027_v0, %v1026_v35  ;;  %v1399_v46 = vpack.c.bf16 %v1029_v43, %v1028_v59 }
 0x1e7   : > { %v1024_v36 = vadd.f32 %v2665_v27, %v932_v12  ;;  %v1025_v32 = vadd.f32 %v2668_v4, %v933_v2  ;;  %1380 = vst [vmem:[%s326_s30] sm:$0xff] %v1379_v31   ;;  %v1404_v60 = vpack.c.bf16 %v1031_v47, %v1030_v10  ;;  %v1414_v41 = vpack.c.bf16 %v1035_v56, %v1034_v48 }
 0x1e8   : > { %v1032_v3 = vadd.f32 %v2673_v11, %v940_v9  ;;  %v1033_v34 = vadd.f32 %v2676_v29, %v941_v61  ;;  %1416 = vst [vmem:[%s326_s30 + $0x8] sm:$0xff] %v1384_v33   ;;  %1418 = vst [vmem:[%s326_s30 + $0x18] sm:$0xff] %v1394_v8  }
 0x1e9   : > { %1419 = vst [vmem:[%s326_s30 + $0x20] sm:$0xff] %v1399_v46   ;;  %v1389_v5 = vpack.c.bf16 %v1025_v32, %v1024_v36  ;;  %1420 = vst [vmem:[%s326_s30 + $0x28] sm:$0xff] %v1404_v60  }
 0x1ea   : > { %1422 = vst [vmem:[%s326_s30 + $0x38] sm:$0xff] %v1414_v41   ;;  %v1409_v27 = vpack.c.bf16 %v1033_v34, %v1032_v3 }
 0x1eb   : > { %1417 = vst [vmem:[%s326_s30 + $0x10] sm:$0xff] %v1389_v5  }
 0x1ec   : > { %1421 = vst [vmem:[%s326_s30 + $0x30] sm:$0xff] %v1409_v27  }
 0x1ed   : > { %1837 = shalt.err (!%p1834_p11)
}
 0x1ee   : > { %s1838_s14 = scalar_lea.hbm %s2956_s10, 1024  ;;  %s1842_s13 = scalar_lea.hbm %s3023_s8, 3072 }
 0x1ef   : > { %p1839_p2 = scmp.ne.s32.totalorder %s2956_s10, %s1838_s14  ;;  %p1843_p8 = scmp.lt.s32.totalorder %s2956_s10, %s3023_s8 }
 0x1f0   : > { %p1844_p3 = scmp.lt.s32.totalorder %s1842_s13, %s1838_s14 }
 0x1f1   : > { %p1840_p4 = pnand %p1839_p2, %p3156_p10 }
 0x1f2   : > { %p1845_p9 = por %p1844_p3, %p1843_p8 }
 0x1f3   : > { %p1841_p7 = pneg %p1840_p4 }
 0x1f5   : > { %p1846_p1 = pnand %p1845_p9, %p1841_p7 }
 0x1f7   : > { %1849 = shalt.err (!%p1846_p1)
}
 0x1f8   : > { %s1965_s18 = smov 64   ;;  %s1966_s22 = smov 4  }
 0x1f9   : > { %1502 = dma.vmem_to_hbm [thread:$0]  (%p3156_p10), %s2958_s24, 1024, %s2956_s10, %s1122_s17, %s1965_s18, %s1965_s18, %s1966_s22  }
 0x1fa PF: > { %s3160_s5 = sld [smem:[#allocation32_spill]]  ;;  %p1527_p6 = scmp.ge.s32.totalorder %s1950_s28, 2 }
 0x1fb   : > { %s1166_s2 = sand.u32 1, %s1938_s25  }
 0x1fc   : > { %s1167_s9 = scalar_lea.sflag [#allocation9], %s1166_s2 }
 0x200   : > { %p3161_p12 = scmp.ne.s32.totalorder %s3160_s5, 0 }
 0x202   : > { %p1520_p13 = pnand %p1527_p6, %p3161_p12 }
 0x204   : > { %p1521_p0 = pneg %p1520_p13 }
 0x206   : > { %1905 = dma.done.wait (%p1521_p0), %s1167_s9, 2048  }
 0x207   : > { %1907 = vsyncadd (%p1521_p0), %s1167_s9, 4294965248  ;;  %s1176_s30 = scalar_lea.sflag [#allocation15], %s1166_s2 }
 0x208   : > { %1909 = dma.done.wait (%p1521_p0), %s1176_s30, 1024  }
 0x209   : > { %1911 = vsyncadd (%p1521_p0), %s1176_s30, 4294966272  ;;  %s3162_s28 = sld [smem:[#allocation29_spill]]  ;;  %s3169_s3 = smov %s1918_s20 }
 0x20a   : > { %s3163_s12 = sld [smem:[#allocation26_spill]]  ;;  %s3171_s22 = smov %s1930_s23 }
 0x20b   : > { %s3164_s21 = sld [smem:[#allocation33_spill]]  ;;  %s3173_s25 = smov %s1942_s26 }
 0x20c   : > { %s3165_s4 = sld [smem:[#allocation27_spill]] }
 0x20d   : > { %s3166_s24 = sld [smem:[#allocation30_spill]] }
 0x20e   : > { %s3167_s29 = sld [smem:[#allocation28_spill]] }
 0x20f   : > { %s3168_s27 = sld [smem:[#allocation31_spill]]  ;;  %p44_p10 = scmp.ge.s32.totalorder %s3162_s28, 5  }
 0x210   : > { %s3170_s20 = smov %s3163_s12 }
 0x211   :  { %46 = sbr.rel (!%p44_p10) target bundleno = 49 (0x31), region = 118 }
 0x212   : > { %s3172_s23 = smov %s3165_s4 }
 0x214   : > { %s3174_s26 = smov %s3167_s29 }
 0x216   :  { %1181 = vsyncpa [#allocation8], 1 }
 0x217   :  { %1183 = vsyncpa [#allocation8 + $0x1], 1 }
 0x218   :  { %1184 = vsyncpa [#allocation11], 1 }
 0x219   :  { %1186 = vsyncpa [#allocation11 + $0x1], 1 }
 0x21a   :  { %1187 = vsyncpa [#allocation9], 1 }
 0x21b   :  { %1189 = vsyncpa [#allocation9 + $0x1], 1 }
 0x21c   :  { %1190 = vsyncpa [#allocation15], 1 }
 0x21d   :  { %1192 = vsyncpa [#allocation15 + $0x1], 1 }

</bundles_post_ra>
